<compile_context>
chip_gen: v5e
topology: v5e:2x2
jax: 0.10.0
libtpu: 0.0.40
codegen_flags: <defaults>
</compile_context>

<pallas_src>
import functools

import jax
import jax.numpy as jnp
from jax.experimental import pallas as pl
from jax.experimental.pallas import tpu as pltpu

LANE = 128      # TPU lane width; head output is padded to this for an unmasked store.
SUBLANE = 8     # f32 sublane count; batch is padded up to a multiple of this.


def lstm_attention_kernel(ids_ref, emb_ref, wih_ref, whh_ref, b_ref,
                          wout_ref, bout_ref, out_ref, x_scratch):
    """Fused forward pass.

    ids_ref  : (B*T,) int32 in SMEM, laid out ids[b*T + t]   (B = padded batch)
    emb_ref  : (V, 1, E) f32 in VMEM (each row its own tile -> cheap dynamic gather)
    wih_ref  : (E, 4H) f32, gate columns [i | f | o | g]
    whh_ref  : (H, 4H) f32, gate columns [i | f | o | g]
    b_ref    : (1, 4H) f32  (b_ih + b_hh, same column order)
    wout_ref : (H, LANE) f32 (real head in the first O columns, rest zero)
    bout_ref : (1, LANE) f32
    out_ref  : (B, LANE) f32
    x_scratch: (T*B, E) f32 VMEM scratch for the gathered embeddings (time-major rows).
    """
    H = whh_ref.shape[0]
    B = out_ref.shape[0]
    T = ids_ref.shape[0] // B

    # ---- 1) In-kernel embedding gather (replaces jnp.take + permute outside). ----------
    for t in range(T):
        for bi in range(B):
            tok = ids_ref[bi * T + t]                              # SMEM scalar read
            x_scratch[pl.ds(t * B + bi, 1), :] = emb_ref[tok]      # (1, E) row copy

    wih = wih_ref[...]
    whh = whh_ref[...]
    bias = b_ref[...]

    # ---- 2) Hoisted input projection: all T steps in one MXU matmul, bias folded in. ---
    xproj = jnp.dot(x_scratch[...], wih,
                    preferred_element_type=jnp.float32) + bias     # (T*B, 4H)

    # ---- 3) Recurrence: only h @ W_hh remains on the serial h->h critical path. --------
    h = jnp.zeros((B, H), jnp.float32)
    c = jnp.zeros((B, H), jnp.float32)
    hs = []
    # Scaling guardrail: at large T switch this full unroll to lax.fori_loop with a
    # (T, B, H) VMEM scratch for hs (vreg pressure / code size); fine at T=8.
    for t in range(T):
        gates = xproj[t * B:(t + 1) * B, :] + jnp.dot(
            h, whh, preferred_element_type=jnp.float32)            # (B, 4H)
        # Gate order [i | f | o | g]: one sigmoid over 3H lanes, one tanh over H lanes.
        sig = jax.nn.sigmoid(gates[:, :3 * H])
        i_g = sig[:, 0 * H:1 * H]
        f_g = sig[:, 1 * H:2 * H]
        o_g = sig[:, 2 * H:3 * H]
        g_g = jnp.tanh(gates[:, 3 * H:4 * H])
        c = f_g * c + i_g * g_g
        h = o_g * jnp.tanh(c)
        hs.append(h)

    # ---- 4) Dot-product attention over all hidden states; query = final h. -------------
    scores = [jnp.sum(hs[t] * h, axis=-1, keepdims=True) for t in range(T)]   # (B, 1) each
    m = scores[0]
    for t in range(1, T):
        m = jnp.maximum(m, scores[t])
    exps = [jnp.exp(s - m) for s in scores]
    denom = exps[0]
    for t in range(1, T):
        denom = denom + exps[t]
    attn = exps[0] * hs[0]
    for t in range(1, T):
        attn = attn + exps[t] * hs[t]                                          # (B, H)
    r = pl.reciprocal(denom, approx=True)          # EUP slot, off the VPU
    inv = r * (2.0 - denom * r)                    # one Newton step -> ~f32 exact
    attn = attn * inv

    # ---- 5) Fused, lane-padded classification head. -------------------------------------
    logits = jnp.dot(attn, wout_ref[...],
                     preferred_element_type=jnp.float32) + bout_ref[...]       # (B, LANE)
    out_ref[...] = logits.astype(out_ref.dtype)


def lstm_attention_pallas(ids_flat, emb_v1e, w_ih_fused, w_hh_fused, b_fused,
                          w_out_pad, b_out_pad, *, b_pad):
    T = ids_flat.shape[0] // b_pad
    E = emb_v1e.shape[2]
    return pl.pallas_call(
        lstm_attention_kernel,
        out_shape=jax.ShapeDtypeStruct((b_pad, LANE), jnp.float32),
        # Single invocation (no grid): everything is VMEM/SMEM resident at these sizes.
        # If the padded batch ever exceeds one (8, *) tile, add a leading batch-tile grid
        # axis with dimension_semantics=("parallel",) so v7x's 2nd TensorCore gets a shard.
        in_specs=[pl.BlockSpec(memory_space=pltpu.MemorySpace.SMEM)]
        + [pl.BlockSpec(memory_space=pltpu.MemorySpace.VMEM)] * 6,
        out_specs=pl.BlockSpec(memory_space=pltpu.MemorySpace.VMEM),
        scratch_shapes=[pltpu.VMEM((T * b_pad, E), jnp.float32)],
    )(ids_flat, emb_v1e, w_ih_fused, w_hh_fused, b_fused, w_out_pad, b_out_pad)


@functools.partial(jax.jit, static_argnames=("output_size",))
def model_forward(input_sentences, emb_v1e, w_ih_fused, w_hh_fused, b_fused,
                  w_out_pad, b_out_pad, output_size):
    B, T = input_sentences.shape
    b_pad = max(SUBLANE, ((B + SUBLANE - 1) // SUBLANE) * SUBLANE)
    # Pad batch to the sublane boundary with dummy token-0 rows (sliced off below).
    ids = jnp.zeros((b_pad, T), jnp.int32).at[:B, :].set(input_sentences)
    ids_flat = ids.reshape(b_pad * T)
    logits_pad = lstm_attention_pallas(ids_flat, emb_v1e, w_ih_fused, w_hh_fused,
                                       b_fused, w_out_pad, b_out_pad, b_pad=b_pad)
    return logits_pad[:B, :output_size]


def reference_forward(x_emb_tbe, w_ih_g, w_hh_g, b_g, w_out, b_out):
    """Pure-JAX reference with per-gate stacked weights in PyTorch order [i, f, g, o]."""
    T, B, E = x_emb_tbe.shape
    H = w_hh_g.shape[1]

    def step(carry, x_t):
        h, c = carry

        def gate(k):
            return x_t @ w_ih_g[k] + h @ w_hh_g[k] + b_g[k]

        i = jax.nn.sigmoid(gate(0))
        f = jax.nn.sigmoid(gate(1))
        g = jnp.tanh(gate(2))
        o = jax.nn.sigmoid(gate(3))
        c = f * c + i * g
        h = o * jnp.tanh(c)
        return (h, c), h

    h0 = jnp.zeros((B, H), jnp.float32)
    c0 = jnp.zeros((B, H), jnp.float32)
    (h_T, _), hs = jax.lax.scan(step, (h0, c0), x_emb_tbe)      # hs: (T, B, H)
    lstm_out = jnp.transpose(hs, (1, 0, 2))                     # (B, T, H)
    attn_w = jnp.einsum('bth,bh->bt', lstm_out, h_T)            # (B, T)
    soft = jax.nn.softmax(attn_w, axis=1)
    new_h = jnp.einsum('bth,bt->bh', lstm_out, soft)            # (B, H)
    return new_h @ w_out + b_out


if __name__ == "__main__":
    batch_size = 2
    seq_len = 8
    vocab_size = 50
    embedding_length = 32
    hidden_size = 32
    output_size = 2

    key = jax.random.PRNGKey(0)
    keys = jax.random.split(key, 8)

    # Deterministic PyTorch-style init, gate order [i, f, g, o].
    k = 1.0 / jnp.sqrt(jnp.float32(hidden_size))
    emb_table = jax.random.normal(keys[0], (vocab_size, embedding_length), jnp.float32)
    w_ih_g = jax.random.uniform(keys[1], (4, embedding_length, hidden_size),
                                jnp.float32, -k, k)
    w_hh_g = jax.random.uniform(keys[2], (4, hidden_size, hidden_size),
                                jnp.float32, -k, k)
    b_ih = jax.random.uniform(keys[3], (4, 1, hidden_size), jnp.float32, -k, k)
    b_hh = jax.random.uniform(keys[4], (4, 1, hidden_size), jnp.float32, -k, k)
    b_g = b_ih + b_hh                                           # PyTorch adds both biases
    w_out = jax.random.uniform(keys[5], (hidden_size, output_size), jnp.float32, -k, k)
    b_out = jax.random.uniform(keys[6], (1, output_size), jnp.float32, -k, k)

    # Kernel-side parameter prep.
    # Kernel gate order is [i | f | o | g] (sigmoid gates contiguous); PyTorch order is
    # [i, f, g, o] -> permutation (0, 1, 3, 2). Kernel slices match this order exactly.
    gate_perm = (0, 1, 3, 2)
    w_ih_fused = jnp.concatenate([w_ih_g[i] for i in gate_perm], axis=-1)   # (E, 4H)
    w_hh_fused = jnp.concatenate([w_hh_g[i] for i in gate_perm], axis=-1)   # (H, 4H)
    b_fused = jnp.concatenate([b_g[i] for i in gate_perm], axis=-1)         # (1, 4H)
    # Embedding rows as individual (1, E) tiles for cheap in-kernel dynamic gathers.
    emb_v1e = emb_table.reshape(vocab_size, 1, embedding_length)
    # Lane-padded head so the kernel writeback is a single unmasked (8, 128) store.
    w_out_pad = jnp.zeros((hidden_size, LANE), jnp.float32).at[:, :output_size].set(w_out)
    b_out_pad = jnp.zeros((1, LANE), jnp.float32).at[:, :output_size].set(b_out)

    # Input: token indices of shape (batch, seq).
    input_sentences = jax.random.randint(keys[7], (batch_size, seq_len),
                                         0, vocab_size, jnp.int32)

    logits = model_forward(input_sentences, emb_v1e, w_ih_fused, w_hh_fused,
                           b_fused, w_out_pad, b_out_pad, output_size)
    logits = jax.block_until_ready(logits)

    # Independent pure-JAX reference (un-fused per-gate weights, XLA gather/softmax/head).
    x_emb = jnp.take(emb_table, input_sentences, axis=0)
    x_emb_tbe = jnp.transpose(x_emb, (1, 0, 2))
    ref = reference_forward(x_emb_tbe, w_ih_g, w_hh_g, b_g, w_out, b_out)

    assert logits.shape == (batch_size, output_size)
    assert jnp.allclose(logits, ref, atol=5e-4, rtol=5e-4), (
        f"max abs diff = {jnp.max(jnp.abs(logits - ref))}")

    print("KERNEL_OK")
</pallas_src>

<mosaic_0001>
module attributes {stable_mosaic.version = 11 : i64} {
  func.func @lstm_attention_kernel(%arg0: memref<64xi32, #tpu.memory_space<smem>>, %arg1: memref<50x1x32xf32, #tpu.memory_space<vmem>>, %arg2: memref<32x128xf32, #tpu.memory_space<vmem>>, %arg3: memref<32x128xf32, #tpu.memory_space<vmem>>, %arg4: memref<1x128xf32, #tpu.memory_space<vmem>>, %arg5: memref<32x128xf32, #tpu.memory_space<vmem>>, %arg6: memref<1x128xf32, #tpu.memory_space<vmem>>, %arg7: memref<8x128xf32, #tpu.memory_space<vmem>>, %arg8: memref<64x32xf32, #tpu.memory_space<vmem>>) attributes {dimension_semantics = [], scalar_prefetch = 0 : i64, scratch_operands = 1 : i64, tpu.core_type = #tpu.core_type<tc>} {
    %c0 = arith.constant 0 : index
    %0 = memref.load %arg0[%c0] : memref<64xi32, #tpu.memory_space<smem>>
    %1 = arith.index_cast %0 : i32 to index
    %c0_0 = arith.constant 0 : index
    %c0_1 = arith.constant 0 : index
    %2 = vector.load %arg1[%1, %c0_0, %c0_1] : memref<50x1x32xf32, #tpu.memory_space<vmem>>, vector<1x1x32xf32>
    %3 = vector.shape_cast %2 : vector<1x1x32xf32> to vector<1x32xf32>
    %c0_2 = arith.constant 0 : index
    %c0_3 = arith.constant 0 : index
    %4 = vector.load %arg8[%c0_2, %c0_3] : memref<64x32xf32, #tpu.memory_space<vmem>>, vector<1x32xf32>
    tpu.vector_store %arg8[%c0_2, %c0_3], %3 {strides = array<i32>} : memref<64x32xf32, #tpu.memory_space<vmem>>, vector<1x32xf32>,
    %c8 = arith.constant 8 : index
    %5 = memref.load %arg0[%c8] : memref<64xi32, #tpu.memory_space<smem>>
    %6 = arith.index_cast %5 : i32 to index
    %c0_4 = arith.constant 0 : index
    %c0_5 = arith.constant 0 : index
    %7 = vector.load %arg1[%6, %c0_4, %c0_5] : memref<50x1x32xf32, #tpu.memory_space<vmem>>, vector<1x1x32xf32>
    %8 = vector.shape_cast %7 : vector<1x1x32xf32> to vector<1x32xf32>
    %c1 = arith.constant 1 : index
    %c0_6 = arith.constant 0 : index
    %9 = vector.load %arg8[%c1, %c0_6] : memref<64x32xf32, #tpu.memory_space<vmem>>, vector<1x32xf32>
    tpu.vector_store %arg8[%c1, %c0_6], %8 {strides = array<i32>} : memref<64x32xf32, #tpu.memory_space<vmem>>, vector<1x32xf32>,
    %c16 = arith.constant 16 : index
    %10 = memref.load %arg0[%c16] : memref<64xi32, #tpu.memory_space<smem>>
    %11 = arith.index_cast %10 : i32 to index
    %c0_7 = arith.constant 0 : index
    %c0_8 = arith.constant 0 : index
    %12 = vector.load %arg1[%11, %c0_7, %c0_8] : memref<50x1x32xf32, #tpu.memory_space<vmem>>, vector<1x1x32xf32>
    %13 = vector.shape_cast %12 : vector<1x1x32xf32> to vector<1x32xf32>
    %c2 = arith.constant 2 : index
    %c0_9 = arith.constant 0 : index
    %14 = vector.load %arg8[%c2, %c0_9] : memref<64x32xf32, #tpu.memory_space<vmem>>, vector<1x32xf32>
    tpu.vector_store %arg8[%c2, %c0_9], %13 {strides = array<i32>} : memref<64x32xf32, #tpu.memory_space<vmem>>, vector<1x32xf32>,
    %c24 = arith.constant 24 : index
    %15 = memref.load %arg0[%c24] : memref<64xi32, #tpu.memory_space<smem>>
    %16 = arith.index_cast %15 : i32 to index
    %c0_10 = arith.constant 0 : index
    %c0_11 = arith.constant 0 : index
    %17 = vector.load %arg1[%16, %c0_10, %c0_11] : memref<50x1x32xf32, #tpu.memory_space<vmem>>, vector<1x1x32xf32>
    %18 = vector.shape_cast %17 : vector<1x1x32xf32> to vector<1x32xf32>
    %c3 = arith.constant 3 : index
    %c0_12 = arith.constant 0 : index
    %19 = vector.load %arg8[%c3, %c0_12] : memref<64x32xf32, #tpu.memory_space<vmem>>, vector<1x32xf32>
    tpu.vector_store %arg8[%c3, %c0_12], %18 {strides = array<i32>} : memref<64x32xf32, #tpu.memory_space<vmem>>, vector<1x32xf32>,
    %c32 = arith.constant 32 : index
    %20 = memref.load %arg0[%c32] : memref<64xi32, #tpu.memory_space<smem>>
    %21 = arith.index_cast %20 : i32 to index
    %c0_13 = arith.constant 0 : index
    %c0_14 = arith.constant 0 : index
    %22 = vector.load %arg1[%21, %c0_13, %c0_14] : memref<50x1x32xf32, #tpu.memory_space<vmem>>, vector<1x1x32xf32>
    %23 = vector.shape_cast %22 : vector<1x1x32xf32> to vector<1x32xf32>
    %c4 = arith.constant 4 : index
    %c0_15 = arith.constant 0 : index
    %24 = vector.load %arg8[%c4, %c0_15] : memref<64x32xf32, #tpu.memory_space<vmem>>, vector<1x32xf32>
    tpu.vector_store %arg8[%c4, %c0_15], %23 {strides = array<i32>} : memref<64x32xf32, #tpu.memory_space<vmem>>, vector<1x32xf32>,
    %c40 = arith.constant 40 : index
    %25 = memref.load %arg0[%c40] : memref<64xi32, #tpu.memory_space<smem>>
    %26 = arith.index_cast %25 : i32 to index
    %c0_16 = arith.constant 0 : index
    %c0_17 = arith.constant 0 : index
    %27 = vector.load %arg1[%26, %c0_16, %c0_17] : memref<50x1x32xf32, #tpu.memory_space<vmem>>, vector<1x1x32xf32>
    %28 = vector.shape_cast %27 : vector<1x1x32xf32> to vector<1x32xf32>
    %c5 = arith.constant 5 : index
    %c0_18 = arith.constant 0 : index
    %29 = vector.load %arg8[%c5, %c0_18] : memref<64x32xf32, #tpu.memory_space<vmem>>, vector<1x32xf32>
    tpu.vector_store %arg8[%c5, %c0_18], %28 {strides = array<i32>} : memref<64x32xf32, #tpu.memory_space<vmem>>, vector<1x32xf32>,
    %c48 = arith.constant 48 : index
    %30 = memref.load %arg0[%c48] : memref<64xi32, #tpu.memory_space<smem>>
    %31 = arith.index_cast %30 : i32 to index
    %c0_19 = arith.constant 0 : index
    %c0_20 = arith.constant 0 : index
    %32 = vector.load %arg1[%31, %c0_19, %c0_20] : memref<50x1x32xf32, #tpu.memory_space<vmem>>, vector<1x1x32xf32>
    %33 = vector.shape_cast %32 : vector<1x1x32xf32> to vector<1x32xf32>
    %c6 = arith.constant 6 : index
    %c0_21 = arith.constant 0 : index
    %34 = vector.load %arg8[%c6, %c0_21] : memref<64x32xf32, #tpu.memory_space<vmem>>, vector<1x32xf32>
    tpu.vector_store %arg8[%c6, %c0_21], %33 {strides = array<i32>} : memref<64x32xf32, #tpu.memory_space<vmem>>, vector<1x32xf32>,
    %c56 = arith.constant 56 : index
    %35 = memref.load %arg0[%c56] : memref<64xi32, #tpu.memory_space<smem>>
    %36 = arith.index_cast %35 : i32 to index
    %c0_22 = arith.constant 0 : index
    %c0_23 = arith.constant 0 : index
    %37 = vector.load %arg1[%36, %c0_22, %c0_23] : memref<50x1x32xf32, #tpu.memory_space<vmem>>, vector<1x1x32xf32>
    %38 = vector.shape_cast %37 : vector<1x1x32xf32> to vector<1x32xf32>
    %c7 = arith.constant 7 : index
    %c0_24 = arith.constant 0 : index
    %39 = vector.load %arg8[%c7, %c0_24] : memref<64x32xf32, #tpu.memory_space<vmem>>, vector<1x32xf32>
    tpu.vector_store %arg8[%c7, %c0_24], %38 {strides = array<i32>} : memref<64x32xf32, #tpu.memory_space<vmem>>, vector<1x32xf32>,
    %c1_25 = arith.constant 1 : index
    %40 = memref.load %arg0[%c1_25] : memref<64xi32, #tpu.memory_space<smem>>
    %41 = arith.index_cast %40 : i32 to index
    %c0_26 = arith.constant 0 : index
    %c0_27 = arith.constant 0 : index
    %42 = vector.load %arg1[%41, %c0_26, %c0_27] : memref<50x1x32xf32, #tpu.memory_space<vmem>>, vector<1x1x32xf32>
    %43 = vector.shape_cast %42 : vector<1x1x32xf32> to vector<1x32xf32>
    %c8_28 = arith.constant 8 : index
    %c0_29 = arith.constant 0 : index
    %44 = vector.load %arg8[%c8_28, %c0_29] : memref<64x32xf32, #tpu.memory_space<vmem>>, vector<1x32xf32>
    tpu.vector_store %arg8[%c8_28, %c0_29], %43 {strides = array<i32>} : memref<64x32xf32, #tpu.memory_space<vmem>>, vector<1x32xf32>,
    %c9 = arith.constant 9 : index
    %45 = memref.load %arg0[%c9] : memref<64xi32, #tpu.memory_space<smem>>
    %46 = arith.index_cast %45 : i32 to index
    %c0_30 = arith.constant 0 : index
    %c0_31 = arith.constant 0 : index
    %47 = vector.load %arg1[%46, %c0_30, %c0_31] : memref<50x1x32xf32, #tpu.memory_space<vmem>>, vector<1x1x32xf32>
    %48 = vector.shape_cast %47 : vector<1x1x32xf32> to vector<1x32xf32>
    %c9_32 = arith.constant 9 : index
    %c0_33 = arith.constant 0 : index
    %49 = vector.load %arg8[%c9_32, %c0_33] : memref<64x32xf32, #tpu.memory_space<vmem>>, vector<1x32xf32>
    tpu.vector_store %arg8[%c9_32, %c0_33], %48 {strides = array<i32>} : memref<64x32xf32, #tpu.memory_space<vmem>>, vector<1x32xf32>,
    %c17 = arith.constant 17 : index
    %50 = memref.load %arg0[%c17] : memref<64xi32, #tpu.memory_space<smem>>
    %51 = arith.index_cast %50 : i32 to index
    %c0_34 = arith.constant 0 : index
    %c0_35 = arith.constant 0 : index
    %52 = vector.load %arg1[%51, %c0_34, %c0_35] : memref<50x1x32xf32, #tpu.memory_space<vmem>>, vector<1x1x32xf32>
    %53 = vector.shape_cast %52 : vector<1x1x32xf32> to vector<1x32xf32>
    %c10 = arith.constant 10 : index
    %c0_36 = arith.constant 0 : index
    %54 = vector.load %arg8[%c10, %c0_36] : memref<64x32xf32, #tpu.memory_space<vmem>>, vector<1x32xf32>
    tpu.vector_store %arg8[%c10, %c0_36], %53 {strides = array<i32>} : memref<64x32xf32, #tpu.memory_space<vmem>>, vector<1x32xf32>,
    %c25 = arith.constant 25 : index
    %55 = memref.load %arg0[%c25] : memref<64xi32, #tpu.memory_space<smem>>
    %56 = arith.index_cast %55 : i32 to index
    %c0_37 = arith.constant 0 : index
    %c0_38 = arith.constant 0 : index
    %57 = vector.load %arg1[%56, %c0_37, %c0_38] : memref<50x1x32xf32, #tpu.memory_space<vmem>>, vector<1x1x32xf32>
    %58 = vector.shape_cast %57 : vector<1x1x32xf32> to vector<1x32xf32>
    %c11 = arith.constant 11 : index
    %c0_39 = arith.constant 0 : index
    %59 = vector.load %arg8[%c11, %c0_39] : memref<64x32xf32, #tpu.memory_space<vmem>>, vector<1x32xf32>
    tpu.vector_store %arg8[%c11, %c0_39], %58 {strides = array<i32>} : memref<64x32xf32, #tpu.memory_space<vmem>>, vector<1x32xf32>,
    %c33 = arith.constant 33 : index
    %60 = memref.load %arg0[%c33] : memref<64xi32, #tpu.memory_space<smem>>
    %61 = arith.index_cast %60 : i32 to index
    %c0_40 = arith.constant 0 : index
    %c0_41 = arith.constant 0 : index
    %62 = vector.load %arg1[%61, %c0_40, %c0_41] : memref<50x1x32xf32, #tpu.memory_space<vmem>>, vector<1x1x32xf32>
    %63 = vector.shape_cast %62 : vector<1x1x32xf32> to vector<1x32xf32>
    %c12 = arith.constant 12 : index
    %c0_42 = arith.constant 0 : index
    %64 = vector.load %arg8[%c12, %c0_42] : memref<64x32xf32, #tpu.memory_space<vmem>>, vector<1x32xf32>
    tpu.vector_store %arg8[%c12, %c0_42], %63 {strides = array<i32>} : memref<64x32xf32, #tpu.memory_space<vmem>>, vector<1x32xf32>,
    %c41 = arith.constant 41 : index
    %65 = memref.load %arg0[%c41] : memref<64xi32, #tpu.memory_space<smem>>
    %66 = arith.index_cast %65 : i32 to index
    %c0_43 = arith.constant 0 : index
    %c0_44 = arith.constant 0 : index
    %67 = vector.load %arg1[%66, %c0_43, %c0_44] : memref<50x1x32xf32, #tpu.memory_space<vmem>>, vector<1x1x32xf32>
    %68 = vector.shape_cast %67 : vector<1x1x32xf32> to vector<1x32xf32>
    %c13 = arith.constant 13 : index
    %c0_45 = arith.constant 0 : index
    %69 = vector.load %arg8[%c13, %c0_45] : memref<64x32xf32, #tpu.memory_space<vmem>>, vector<1x32xf32>
    tpu.vector_store %arg8[%c13, %c0_45], %68 {strides = array<i32>} : memref<64x32xf32, #tpu.memory_space<vmem>>, vector<1x32xf32>,
    %c49 = arith.constant 49 : index
    %70 = memref.load %arg0[%c49] : memref<64xi32, #tpu.memory_space<smem>>
    %71 = arith.index_cast %70 : i32 to index
    %c0_46 = arith.constant 0 : index
    %c0_47 = arith.constant 0 : index
    %72 = vector.load %arg1[%71, %c0_46, %c0_47] : memref<50x1x32xf32, #tpu.memory_space<vmem>>, vector<1x1x32xf32>
    %73 = vector.shape_cast %72 : vector<1x1x32xf32> to vector<1x32xf32>
    %c14 = arith.constant 14 : index
    %c0_48 = arith.constant 0 : index
    %74 = vector.load %arg8[%c14, %c0_48] : memref<64x32xf32, #tpu.memory_space<vmem>>, vector<1x32xf32>
    tpu.vector_store %arg8[%c14, %c0_48], %73 {strides = array<i32>} : memref<64x32xf32, #tpu.memory_space<vmem>>, vector<1x32xf32>,
    %c57 = arith.constant 57 : index
    %75 = memref.load %arg0[%c57] : memref<64xi32, #tpu.memory_space<smem>>
    %76 = arith.index_cast %75 : i32 to index
    %c0_49 = arith.constant 0 : index
    %c0_50 = arith.constant 0 : index
    %77 = vector.load %arg1[%76, %c0_49, %c0_50] : memref<50x1x32xf32, #tpu.memory_space<vmem>>, vector<1x1x32xf32>
    %78 = vector.shape_cast %77 : vector<1x1x32xf32> to vector<1x32xf32>
    %c15 = arith.constant 15 : index
    %c0_51 = arith.constant 0 : index
    %79 = vector.load %arg8[%c15, %c0_51] : memref<64x32xf32, #tpu.memory_space<vmem>>, vector<1x32xf32>
    tpu.vector_store %arg8[%c15, %c0_51], %78 {strides = array<i32>} : memref<64x32xf32, #tpu.memory_space<vmem>>, vector<1x32xf32>,
    %c2_52 = arith.constant 2 : index
    %80 = memref.load %arg0[%c2_52] : memref<64xi32, #tpu.memory_space<smem>>
    %81 = arith.index_cast %80 : i32 to index
    %c0_53 = arith.constant 0 : index
    %c0_54 = arith.constant 0 : index
    %82 = vector.load %arg1[%81, %c0_53, %c0_54] : memref<50x1x32xf32, #tpu.memory_space<vmem>>, vector<1x1x32xf32>
    %83 = vector.shape_cast %82 : vector<1x1x32xf32> to vector<1x32xf32>
    %c16_55 = arith.constant 16 : index
    %c0_56 = arith.constant 0 : index
    %84 = vector.load %arg8[%c16_55, %c0_56] : memref<64x32xf32, #tpu.memory_space<vmem>>, vector<1x32xf32>
    tpu.vector_store %arg8[%c16_55, %c0_56], %83 {strides = array<i32>} : memref<64x32xf32, #tpu.memory_space<vmem>>, vector<1x32xf32>,
    %c10_57 = arith.constant 10 : index
    %85 = memref.load %arg0[%c10_57] : memref<64xi32, #tpu.memory_space<smem>>
    %86 = arith.index_cast %85 : i32 to index
    %c0_58 = arith.constant 0 : index
    %c0_59 = arith.constant 0 : index
    %87 = vector.load %arg1[%86, %c0_58, %c0_59] : memref<50x1x32xf32, #tpu.memory_space<vmem>>, vector<1x1x32xf32>
    %88 = vector.shape_cast %87 : vector<1x1x32xf32> to vector<1x32xf32>
    %c17_60 = arith.constant 17 : index
    %c0_61 = arith.constant 0 : index
    %89 = vector.load %arg8[%c17_60, %c0_61] : memref<64x32xf32, #tpu.memory_space<vmem>>, vector<1x32xf32>
    tpu.vector_store %arg8[%c17_60, %c0_61], %88 {strides = array<i32>} : memref<64x32xf32, #tpu.memory_space<vmem>>, vector<1x32xf32>,
    %c18 = arith.constant 18 : index
    %90 = memref.load %arg0[%c18] : memref<64xi32, #tpu.memory_space<smem>>
    %91 = arith.index_cast %90 : i32 to index
    %c0_62 = arith.constant 0 : index
    %c0_63 = arith.constant 0 : index
    %92 = vector.load %arg1[%91, %c0_62, %c0_63] : memref<50x1x32xf32, #tpu.memory_space<vmem>>, vector<1x1x32xf32>
    %93 = vector.shape_cast %92 : vector<1x1x32xf32> to vector<1x32xf32>
    %c18_64 = arith.constant 18 : index
    %c0_65 = arith.constant 0 : index
    %94 = vector.load %arg8[%c18_64, %c0_65] : memref<64x32xf32, #tpu.memory_space<vmem>>, vector<1x32xf32>
    tpu.vector_store %arg8[%c18_64, %c0_65], %93 {strides = array<i32>} : memref<64x32xf32, #tpu.memory_space<vmem>>, vector<1x32xf32>,
    %c26 = arith.constant 26 : index
    %95 = memref.load %arg0[%c26] : memref<64xi32, #tpu.memory_space<smem>>
    %96 = arith.index_cast %95 : i32 to index
    %c0_66 = arith.constant 0 : index
    %c0_67 = arith.constant 0 : index
    %97 = vector.load %arg1[%96, %c0_66, %c0_67] : memref<50x1x32xf32, #tpu.memory_space<vmem>>, vector<1x1x32xf32>
    %98 = vector.shape_cast %97 : vector<1x1x32xf32> to vector<1x32xf32>
    %c19 = arith.constant 19 : index
    %c0_68 = arith.constant 0 : index
    %99 = vector.load %arg8[%c19, %c0_68] : memref<64x32xf32, #tpu.memory_space<vmem>>, vector<1x32xf32>
    tpu.vector_store %arg8[%c19, %c0_68], %98 {strides = array<i32>} : memref<64x32xf32, #tpu.memory_space<vmem>>, vector<1x32xf32>,
    %c34 = arith.constant 34 : index
    %100 = memref.load %arg0[%c34] : memref<64xi32, #tpu.memory_space<smem>>
    %101 = arith.index_cast %100 : i32 to index
    %c0_69 = arith.constant 0 : index
    %c0_70 = arith.constant 0 : index
    %102 = vector.load %arg1[%101, %c0_69, %c0_70] : memref<50x1x32xf32, #tpu.memory_space<vmem>>, vector<1x1x32xf32>
    %103 = vector.shape_cast %102 : vector<1x1x32xf32> to vector<1x32xf32>
    %c20 = arith.constant 20 : index
    %c0_71 = arith.constant 0 : index
    %104 = vector.load %arg8[%c20, %c0_71] : memref<64x32xf32, #tpu.memory_space<vmem>>, vector<1x32xf32>
    tpu.vector_store %arg8[%c20, %c0_71], %103 {strides = array<i32>} : memref<64x32xf32, #tpu.memory_space<vmem>>, vector<1x32xf32>,
    %c42 = arith.constant 42 : index
    %105 = memref.load %arg0[%c42] : memref<64xi32, #tpu.memory_space<smem>>
    %106 = arith.index_cast %105 : i32 to index
    %c0_72 = arith.constant 0 : index
    %c0_73 = arith.constant 0 : index
    %107 = vector.load %arg1[%106, %c0_72, %c0_73] : memref<50x1x32xf32, #tpu.memory_space<vmem>>, vector<1x1x32xf32>
    %108 = vector.shape_cast %107 : vector<1x1x32xf32> to vector<1x32xf32>
    %c21 = arith.constant 21 : index
    %c0_74 = arith.constant 0 : index
    %109 = vector.load %arg8[%c21, %c0_74] : memref<64x32xf32, #tpu.memory_space<vmem>>, vector<1x32xf32>
    tpu.vector_store %arg8[%c21, %c0_74], %108 {strides = array<i32>} : memref<64x32xf32, #tpu.memory_space<vmem>>, vector<1x32xf32>,
    %c50 = arith.constant 50 : index
    %110 = memref.load %arg0[%c50] : memref<64xi32, #tpu.memory_space<smem>>
    %111 = arith.index_cast %110 : i32 to index
    %c0_75 = arith.constant 0 : index
    %c0_76 = arith.constant 0 : index
    %112 = vector.load %arg1[%111, %c0_75, %c0_76] : memref<50x1x32xf32, #tpu.memory_space<vmem>>, vector<1x1x32xf32>
    %113 = vector.shape_cast %112 : vector<1x1x32xf32> to vector<1x32xf32>
    %c22 = arith.constant 22 : index
    %c0_77 = arith.constant 0 : index
    %114 = vector.load %arg8[%c22, %c0_77] : memref<64x32xf32, #tpu.memory_space<vmem>>, vector<1x32xf32>
    tpu.vector_store %arg8[%c22, %c0_77], %113 {strides = array<i32>} : memref<64x32xf32, #tpu.memory_space<vmem>>, vector<1x32xf32>,
    %c58 = arith.constant 58 : index
    %115 = memref.load %arg0[%c58] : memref<64xi32, #tpu.memory_space<smem>>
    %116 = arith.index_cast %115 : i32 to index
    %c0_78 = arith.constant 0 : index
    %c0_79 = arith.constant 0 : index
    %117 = vector.load %arg1[%116, %c0_78, %c0_79] : memref<50x1x32xf32, #tpu.memory_space<vmem>>, vector<1x1x32xf32>
    %118 = vector.shape_cast %117 : vector<1x1x32xf32> to vector<1x32xf32>
    %c23 = arith.constant 23 : index
    %c0_80 = arith.constant 0 : index
    %119 = vector.load %arg8[%c23, %c0_80] : memref<64x32xf32, #tpu.memory_space<vmem>>, vector<1x32xf32>
    tpu.vector_store %arg8[%c23, %c0_80], %118 {strides = array<i32>} : memref<64x32xf32, #tpu.memory_space<vmem>>, vector<1x32xf32>,
    %c3_81 = arith.constant 3 : index
    %120 = memref.load %arg0[%c3_81] : memref<64xi32, #tpu.memory_space<smem>>
    %121 = arith.index_cast %120 : i32 to index
    %c0_82 = arith.constant 0 : index
    %c0_83 = arith.constant 0 : index
    %122 = vector.load %arg1[%121, %c0_82, %c0_83] : memref<50x1x32xf32, #tpu.memory_space<vmem>>, vector<1x1x32xf32>
    %123 = vector.shape_cast %122 : vector<1x1x32xf32> to vector<1x32xf32>
    %c24_84 = arith.constant 24 : index
    %c0_85 = arith.constant 0 : index
    %124 = vector.load %arg8[%c24_84, %c0_85] : memref<64x32xf32, #tpu.memory_space<vmem>>, vector<1x32xf32>
    tpu.vector_store %arg8[%c24_84, %c0_85], %123 {strides = array<i32>} : memref<64x32xf32, #tpu.memory_space<vmem>>, vector<1x32xf32>,
    %c11_86 = arith.constant 11 : index
    %125 = memref.load %arg0[%c11_86] : memref<64xi32, #tpu.memory_space<smem>>
    %126 = arith.index_cast %125 : i32 to index
    %c0_87 = arith.constant 0 : index
    %c0_88 = arith.constant 0 : index
    %127 = vector.load %arg1[%126, %c0_87, %c0_88] : memref<50x1x32xf32, #tpu.memory_space<vmem>>, vector<1x1x32xf32>
    %128 = vector.shape_cast %127 : vector<1x1x32xf32> to vector<1x32xf32>
    %c25_89 = arith.constant 25 : index
    %c0_90 = arith.constant 0 : index
    %129 = vector.load %arg8[%c25_89, %c0_90] : memref<64x32xf32, #tpu.memory_space<vmem>>, vector<1x32xf32>
    tpu.vector_store %arg8[%c25_89, %c0_90], %128 {strides = array<i32>} : memref<64x32xf32, #tpu.memory_space<vmem>>, vector<1x32xf32>,
    %c19_91 = arith.constant 19 : index
    %130 = memref.load %arg0[%c19_91] : memref<64xi32, #tpu.memory_space<smem>>
    %131 = arith.index_cast %130 : i32 to index
    %c0_92 = arith.constant 0 : index
    %c0_93 = arith.constant 0 : index
    %132 = vector.load %arg1[%131, %c0_92, %c0_93] : memref<50x1x32xf32, #tpu.memory_space<vmem>>, vector<1x1x32xf32>
    %133 = vector.shape_cast %132 : vector<1x1x32xf32> to vector<1x32xf32>
    %c26_94 = arith.constant 26 : index
    %c0_95 = arith.constant 0 : index
    %134 = vector.load %arg8[%c26_94, %c0_95] : memref<64x32xf32, #tpu.memory_space<vmem>>, vector<1x32xf32>
    tpu.vector_store %arg8[%c26_94, %c0_95], %133 {strides = array<i32>} : memref<64x32xf32, #tpu.memory_space<vmem>>, vector<1x32xf32>,
    %c27 = arith.constant 27 : index
    %135 = memref.load %arg0[%c27] : memref<64xi32, #tpu.memory_space<smem>>
    %136 = arith.index_cast %135 : i32 to index
    %c0_96 = arith.constant 0 : index
    %c0_97 = arith.constant 0 : index
    %137 = vector.load %arg1[%136, %c0_96, %c0_97] : memref<50x1x32xf32, #tpu.memory_space<vmem>>, vector<1x1x32xf32>
    %138 = vector.shape_cast %137 : vector<1x1x32xf32> to vector<1x32xf32>
    %c27_98 = arith.constant 27 : index
    %c0_99 = arith.constant 0 : index
    %139 = vector.load %arg8[%c27_98, %c0_99] : memref<64x32xf32, #tpu.memory_space<vmem>>, vector<1x32xf32>
    tpu.vector_store %arg8[%c27_98, %c0_99], %138 {strides = array<i32>} : memref<64x32xf32, #tpu.memory_space<vmem>>, vector<1x32xf32>,
    %c35 = arith.constant 35 : index
    %140 = memref.load %arg0[%c35] : memref<64xi32, #tpu.memory_space<smem>>
    %141 = arith.index_cast %140 : i32 to index
    %c0_100 = arith.constant 0 : index
    %c0_101 = arith.constant 0 : index
    %142 = vector.load %arg1[%141, %c0_100, %c0_101] : memref<50x1x32xf32, #tpu.memory_space<vmem>>, vector<1x1x32xf32>
    %143 = vector.shape_cast %142 : vector<1x1x32xf32> to vector<1x32xf32>
    %c28 = arith.constant 28 : index
    %c0_102 = arith.constant 0 : index
    %144 = vector.load %arg8[%c28, %c0_102] : memref<64x32xf32, #tpu.memory_space<vmem>>, vector<1x32xf32>
    tpu.vector_store %arg8[%c28, %c0_102], %143 {strides = array<i32>} : memref<64x32xf32, #tpu.memory_space<vmem>>, vector<1x32xf32>,
    %c43 = arith.constant 43 : index
    %145 = memref.load %arg0[%c43] : memref<64xi32, #tpu.memory_space<smem>>
    %146 = arith.index_cast %145 : i32 to index
    %c0_103 = arith.constant 0 : index
    %c0_104 = arith.constant 0 : index
    %147 = vector.load %arg1[%146, %c0_103, %c0_104] : memref<50x1x32xf32, #tpu.memory_space<vmem>>, vector<1x1x32xf32>
    %148 = vector.shape_cast %147 : vector<1x1x32xf32> to vector<1x32xf32>
    %c29 = arith.constant 29 : index
    %c0_105 = arith.constant 0 : index
    %149 = vector.load %arg8[%c29, %c0_105] : memref<64x32xf32, #tpu.memory_space<vmem>>, vector<1x32xf32>
    tpu.vector_store %arg8[%c29, %c0_105], %148 {strides = array<i32>} : memref<64x32xf32, #tpu.memory_space<vmem>>, vector<1x32xf32>,
    %c51 = arith.constant 51 : index
    %150 = memref.load %arg0[%c51] : memref<64xi32, #tpu.memory_space<smem>>
    %151 = arith.index_cast %150 : i32 to index
    %c0_106 = arith.constant 0 : index
    %c0_107 = arith.constant 0 : index
    %152 = vector.load %arg1[%151, %c0_106, %c0_107] : memref<50x1x32xf32, #tpu.memory_space<vmem>>, vector<1x1x32xf32>
    %153 = vector.shape_cast %152 : vector<1x1x32xf32> to vector<1x32xf32>
    %c30 = arith.constant 30 : index
    %c0_108 = arith.constant 0 : index
    %154 = vector.load %arg8[%c30, %c0_108] : memref<64x32xf32, #tpu.memory_space<vmem>>, vector<1x32xf32>
    tpu.vector_store %arg8[%c30, %c0_108], %153 {strides = array<i32>} : memref<64x32xf32, #tpu.memory_space<vmem>>, vector<1x32xf32>,
    %c59 = arith.constant 59 : index
    %155 = memref.load %arg0[%c59] : memref<64xi32, #tpu.memory_space<smem>>
    %156 = arith.index_cast %155 : i32 to index
    %c0_109 = arith.constant 0 : index
    %c0_110 = arith.constant 0 : index
    %157 = vector.load %arg1[%156, %c0_109, %c0_110] : memref<50x1x32xf32, #tpu.memory_space<vmem>>, vector<1x1x32xf32>
    %158 = vector.shape_cast %157 : vector<1x1x32xf32> to vector<1x32xf32>
    %c31 = arith.constant 31 : index
    %c0_111 = arith.constant 0 : index
    %159 = vector.load %arg8[%c31, %c0_111] : memref<64x32xf32, #tpu.memory_space<vmem>>, vector<1x32xf32>
    tpu.vector_store %arg8[%c31, %c0_111], %158 {strides = array<i32>} : memref<64x32xf32, #tpu.memory_space<vmem>>, vector<1x32xf32>,
    %c4_112 = arith.constant 4 : index
    %160 = memref.load %arg0[%c4_112] : memref<64xi32, #tpu.memory_space<smem>>
    %161 = arith.index_cast %160 : i32 to index
    %c0_113 = arith.constant 0 : index
    %c0_114 = arith.constant 0 : index
    %162 = vector.load %arg1[%161, %c0_113, %c0_114] : memref<50x1x32xf32, #tpu.memory_space<vmem>>, vector<1x1x32xf32>
    %163 = vector.shape_cast %162 : vector<1x1x32xf32> to vector<1x32xf32>
    %c32_115 = arith.constant 32 : index
    %c0_116 = arith.constant 0 : index
    %164 = vector.load %arg8[%c32_115, %c0_116] : memref<64x32xf32, #tpu.memory_space<vmem>>, vector<1x32xf32>
    tpu.vector_store %arg8[%c32_115, %c0_116], %163 {strides = array<i32>} : memref<64x32xf32, #tpu.memory_space<vmem>>, vector<1x32xf32>,
    %c12_117 = arith.constant 12 : index
    %165 = memref.load %arg0[%c12_117] : memref<64xi32, #tpu.memory_space<smem>>
    %166 = arith.index_cast %165 : i32 to index
    %c0_118 = arith.constant 0 : index
    %c0_119 = arith.constant 0 : index
    %167 = vector.load %arg1[%166, %c0_118, %c0_119] : memref<50x1x32xf32, #tpu.memory_space<vmem>>, vector<1x1x32xf32>
    %168 = vector.shape_cast %167 : vector<1x1x32xf32> to vector<1x32xf32>
    %c33_120 = arith.constant 33 : index
    %c0_121 = arith.constant 0 : index
    %169 = vector.load %arg8[%c33_120, %c0_121] : memref<64x32xf32, #tpu.memory_space<vmem>>, vector<1x32xf32>
    tpu.vector_store %arg8[%c33_120, %c0_121], %168 {strides = array<i32>} : memref<64x32xf32, #tpu.memory_space<vmem>>, vector<1x32xf32>,
    %c20_122 = arith.constant 20 : index
    %170 = memref.load %arg0[%c20_122] : memref<64xi32, #tpu.memory_space<smem>>
    %171 = arith.index_cast %170 : i32 to index
    %c0_123 = arith.constant 0 : index
    %c0_124 = arith.constant 0 : index
    %172 = vector.load %arg1[%171, %c0_123, %c0_124] : memref<50x1x32xf32, #tpu.memory_space<vmem>>, vector<1x1x32xf32>
    %173 = vector.shape_cast %172 : vector<1x1x32xf32> to vector<1x32xf32>
    %c34_125 = arith.constant 34 : index
    %c0_126 = arith.constant 0 : index
    %174 = vector.load %arg8[%c34_125, %c0_126] : memref<64x32xf32, #tpu.memory_space<vmem>>, vector<1x32xf32>
    tpu.vector_store %arg8[%c34_125, %c0_126], %173 {strides = array<i32>} : memref<64x32xf32, #tpu.memory_space<vmem>>, vector<1x32xf32>,
    %c28_127 = arith.constant 28 : index
    %175 = memref.load %arg0[%c28_127] : memref<64xi32, #tpu.memory_space<smem>>
    %176 = arith.index_cast %175 : i32 to index
    %c0_128 = arith.constant 0 : index
    %c0_129 = arith.constant 0 : index
    %177 = vector.load %arg1[%176, %c0_128, %c0_129] : memref<50x1x32xf32, #tpu.memory_space<vmem>>, vector<1x1x32xf32>
    %178 = vector.shape_cast %177 : vector<1x1x32xf32> to vector<1x32xf32>
    %c35_130 = arith.constant 35 : index
    %c0_131 = arith.constant 0 : index
    %179 = vector.load %arg8[%c35_130, %c0_131] : memref<64x32xf32, #tpu.memory_space<vmem>>, vector<1x32xf32>
    tpu.vector_store %arg8[%c35_130, %c0_131], %178 {strides = array<i32>} : memref<64x32xf32, #tpu.memory_space<vmem>>, vector<1x32xf32>,
    %c36 = arith.constant 36 : index
    %180 = memref.load %arg0[%c36] : memref<64xi32, #tpu.memory_space<smem>>
    %181 = arith.index_cast %180 : i32 to index
    %c0_132 = arith.constant 0 : index
    %c0_133 = arith.constant 0 : index
    %182 = vector.load %arg1[%181, %c0_132, %c0_133] : memref<50x1x32xf32, #tpu.memory_space<vmem>>, vector<1x1x32xf32>
    %183 = vector.shape_cast %182 : vector<1x1x32xf32> to vector<1x32xf32>
    %c36_134 = arith.constant 36 : index
    %c0_135 = arith.constant 0 : index
    %184 = vector.load %arg8[%c36_134, %c0_135] : memref<64x32xf32, #tpu.memory_space<vmem>>, vector<1x32xf32>
    tpu.vector_store %arg8[%c36_134, %c0_135], %183 {strides = array<i32>} : memref<64x32xf32, #tpu.memory_space<vmem>>, vector<1x32xf32>,
    %c44 = arith.constant 44 : index
    %185 = memref.load %arg0[%c44] : memref<64xi32, #tpu.memory_space<smem>>
    %186 = arith.index_cast %185 : i32 to index
    %c0_136 = arith.constant 0 : index
    %c0_137 = arith.constant 0 : index
    %187 = vector.load %arg1[%186, %c0_136, %c0_137] : memref<50x1x32xf32, #tpu.memory_space<vmem>>, vector<1x1x32xf32>
    %188 = vector.shape_cast %187 : vector<1x1x32xf32> to vector<1x32xf32>
    %c37 = arith.constant 37 : index
    %c0_138 = arith.constant 0 : index
    %189 = vector.load %arg8[%c37, %c0_138] : memref<64x32xf32, #tpu.memory_space<vmem>>, vector<1x32xf32>
    tpu.vector_store %arg8[%c37, %c0_138], %188 {strides = array<i32>} : memref<64x32xf32, #tpu.memory_space<vmem>>, vector<1x32xf32>,
    %c52 = arith.constant 52 : index
    %190 = memref.load %arg0[%c52] : memref<64xi32, #tpu.memory_space<smem>>
    %191 = arith.index_cast %190 : i32 to index
    %c0_139 = arith.constant 0 : index
    %c0_140 = arith.constant 0 : index
    %192 = vector.load %arg1[%191, %c0_139, %c0_140] : memref<50x1x32xf32, #tpu.memory_space<vmem>>, vector<1x1x32xf32>
    %193 = vector.shape_cast %192 : vector<1x1x32xf32> to vector<1x32xf32>
    %c38 = arith.constant 38 : index
    %c0_141 = arith.constant 0 : index
    %194 = vector.load %arg8[%c38, %c0_141] : memref<64x32xf32, #tpu.memory_space<vmem>>, vector<1x32xf32>
    tpu.vector_store %arg8[%c38, %c0_141], %193 {strides = array<i32>} : memref<64x32xf32, #tpu.memory_space<vmem>>, vector<1x32xf32>,
    %c60 = arith.constant 60 : index
    %195 = memref.load %arg0[%c60] : memref<64xi32, #tpu.memory_space<smem>>
    %196 = arith.index_cast %195 : i32 to index
    %c0_142 = arith.constant 0 : index
    %c0_143 = arith.constant 0 : index
    %197 = vector.load %arg1[%196, %c0_142, %c0_143] : memref<50x1x32xf32, #tpu.memory_space<vmem>>, vector<1x1x32xf32>
    %198 = vector.shape_cast %197 : vector<1x1x32xf32> to vector<1x32xf32>
    %c39 = arith.constant 39 : index
    %c0_144 = arith.constant 0 : index
    %199 = vector.load %arg8[%c39, %c0_144] : memref<64x32xf32, #tpu.memory_space<vmem>>, vector<1x32xf32>
    tpu.vector_store %arg8[%c39, %c0_144], %198 {strides = array<i32>} : memref<64x32xf32, #tpu.memory_space<vmem>>, vector<1x32xf32>,
    %c5_145 = arith.constant 5 : index
    %200 = memref.load %arg0[%c5_145] : memref<64xi32, #tpu.memory_space<smem>>
    %201 = arith.index_cast %200 : i32 to index
    %c0_146 = arith.constant 0 : index
    %c0_147 = arith.constant 0 : index
    %202 = vector.load %arg1[%201, %c0_146, %c0_147] : memref<50x1x32xf32, #tpu.memory_space<vmem>>, vector<1x1x32xf32>
    %203 = vector.shape_cast %202 : vector<1x1x32xf32> to vector<1x32xf32>
    %c40_148 = arith.constant 40 : index
    %c0_149 = arith.constant 0 : index
    %204 = vector.load %arg8[%c40_148, %c0_149] : memref<64x32xf32, #tpu.memory_space<vmem>>, vector<1x32xf32>
    tpu.vector_store %arg8[%c40_148, %c0_149], %203 {strides = array<i32>} : memref<64x32xf32, #tpu.memory_space<vmem>>, vector<1x32xf32>,
    %c13_150 = arith.constant 13 : index
    %205 = memref.load %arg0[%c13_150] : memref<64xi32, #tpu.memory_space<smem>>
    %206 = arith.index_cast %205 : i32 to index
    %c0_151 = arith.constant 0 : index
    %c0_152 = arith.constant 0 : index
    %207 = vector.load %arg1[%206, %c0_151, %c0_152] : memref<50x1x32xf32, #tpu.memory_space<vmem>>, vector<1x1x32xf32>
    %208 = vector.shape_cast %207 : vector<1x1x32xf32> to vector<1x32xf32>
    %c41_153 = arith.constant 41 : index
    %c0_154 = arith.constant 0 : index
    %209 = vector.load %arg8[%c41_153, %c0_154] : memref<64x32xf32, #tpu.memory_space<vmem>>, vector<1x32xf32>
    tpu.vector_store %arg8[%c41_153, %c0_154], %208 {strides = array<i32>} : memref<64x32xf32, #tpu.memory_space<vmem>>, vector<1x32xf32>,
    %c21_155 = arith.constant 21 : index
    %210 = memref.load %arg0[%c21_155] : memref<64xi32, #tpu.memory_space<smem>>
    %211 = arith.index_cast %210 : i32 to index
    %c0_156 = arith.constant 0 : index
    %c0_157 = arith.constant 0 : index
    %212 = vector.load %arg1[%211, %c0_156, %c0_157] : memref<50x1x32xf32, #tpu.memory_space<vmem>>, vector<1x1x32xf32>
    %213 = vector.shape_cast %212 : vector<1x1x32xf32> to vector<1x32xf32>
    %c42_158 = arith.constant 42 : index
    %c0_159 = arith.constant 0 : index
    %214 = vector.load %arg8[%c42_158, %c0_159] : memref<64x32xf32, #tpu.memory_space<vmem>>, vector<1x32xf32>
    tpu.vector_store %arg8[%c42_158, %c0_159], %213 {strides = array<i32>} : memref<64x32xf32, #tpu.memory_space<vmem>>, vector<1x32xf32>,
    %c29_160 = arith.constant 29 : index
    %215 = memref.load %arg0[%c29_160] : memref<64xi32, #tpu.memory_space<smem>>
    %216 = arith.index_cast %215 : i32 to index
    %c0_161 = arith.constant 0 : index
    %c0_162 = arith.constant 0 : index
    %217 = vector.load %arg1[%216, %c0_161, %c0_162] : memref<50x1x32xf32, #tpu.memory_space<vmem>>, vector<1x1x32xf32>
    %218 = vector.shape_cast %217 : vector<1x1x32xf32> to vector<1x32xf32>
    %c43_163 = arith.constant 43 : index
    %c0_164 = arith.constant 0 : index
    %219 = vector.load %arg8[%c43_163, %c0_164] : memref<64x32xf32, #tpu.memory_space<vmem>>, vector<1x32xf32>
    tpu.vector_store %arg8[%c43_163, %c0_164], %218 {strides = array<i32>} : memref<64x32xf32, #tpu.memory_space<vmem>>, vector<1x32xf32>,
    %c37_165 = arith.constant 37 : index
    %220 = memref.load %arg0[%c37_165] : memref<64xi32, #tpu.memory_space<smem>>
    %221 = arith.index_cast %220 : i32 to index
    %c0_166 = arith.constant 0 : index
    %c0_167 = arith.constant 0 : index
    %222 = vector.load %arg1[%221, %c0_166, %c0_167] : memref<50x1x32xf32, #tpu.memory_space<vmem>>, vector<1x1x32xf32>
    %223 = vector.shape_cast %222 : vector<1x1x32xf32> to vector<1x32xf32>
    %c44_168 = arith.constant 44 : index
    %c0_169 = arith.constant 0 : index
    %224 = vector.load %arg8[%c44_168, %c0_169] : memref<64x32xf32, #tpu.memory_space<vmem>>, vector<1x32xf32>
    tpu.vector_store %arg8[%c44_168, %c0_169], %223 {strides = array<i32>} : memref<64x32xf32, #tpu.memory_space<vmem>>, vector<1x32xf32>,
    %c45 = arith.constant 45 : index
    %225 = memref.load %arg0[%c45] : memref<64xi32, #tpu.memory_space<smem>>
    %226 = arith.index_cast %225 : i32 to index
    %c0_170 = arith.constant 0 : index
    %c0_171 = arith.constant 0 : index
    %227 = vector.load %arg1[%226, %c0_170, %c0_171] : memref<50x1x32xf32, #tpu.memory_space<vmem>>, vector<1x1x32xf32>
    %228 = vector.shape_cast %227 : vector<1x1x32xf32> to vector<1x32xf32>
    %c45_172 = arith.constant 45 : index
    %c0_173 = arith.constant 0 : index
    %229 = vector.load %arg8[%c45_172, %c0_173] : memref<64x32xf32, #tpu.memory_space<vmem>>, vector<1x32xf32>
    tpu.vector_store %arg8[%c45_172, %c0_173], %228 {strides = array<i32>} : memref<64x32xf32, #tpu.memory_space<vmem>>, vector<1x32xf32>,
    %c53 = arith.constant 53 : index
    %230 = memref.load %arg0[%c53] : memref<64xi32, #tpu.memory_space<smem>>
    %231 = arith.index_cast %230 : i32 to index
    %c0_174 = arith.constant 0 : index
    %c0_175 = arith.constant 0 : index
    %232 = vector.load %arg1[%231, %c0_174, %c0_175] : memref<50x1x32xf32, #tpu.memory_space<vmem>>, vector<1x1x32xf32>
    %233 = vector.shape_cast %232 : vector<1x1x32xf32> to vector<1x32xf32>
    %c46 = arith.constant 46 : index
    %c0_176 = arith.constant 0 : index
    %234 = vector.load %arg8[%c46, %c0_176] : memref<64x32xf32, #tpu.memory_space<vmem>>, vector<1x32xf32>
    tpu.vector_store %arg8[%c46, %c0_176], %233 {strides = array<i32>} : memref<64x32xf32, #tpu.memory_space<vmem>>, vector<1x32xf32>,
    %c61 = arith.constant 61 : index
    %235 = memref.load %arg0[%c61] : memref<64xi32, #tpu.memory_space<smem>>
    %236 = arith.index_cast %235 : i32 to index
    %c0_177 = arith.constant 0 : index
    %c0_178 = arith.constant 0 : index
    %237 = vector.load %arg1[%236, %c0_177, %c0_178] : memref<50x1x32xf32, #tpu.memory_space<vmem>>, vector<1x1x32xf32>
    %238 = vector.shape_cast %237 : vector<1x1x32xf32> to vector<1x32xf32>
    %c47 = arith.constant 47 : index
    %c0_179 = arith.constant 0 : index
    %239 = vector.load %arg8[%c47, %c0_179] : memref<64x32xf32, #tpu.memory_space<vmem>>, vector<1x32xf32>
    tpu.vector_store %arg8[%c47, %c0_179], %238 {strides = array<i32>} : memref<64x32xf32, #tpu.memory_space<vmem>>, vector<1x32xf32>,
    %c6_180 = arith.constant 6 : index
    %240 = memref.load %arg0[%c6_180] : memref<64xi32, #tpu.memory_space<smem>>
    %241 = arith.index_cast %240 : i32 to index
    %c0_181 = arith.constant 0 : index
    %c0_182 = arith.constant 0 : index
    %242 = vector.load %arg1[%241, %c0_181, %c0_182] : memref<50x1x32xf32, #tpu.memory_space<vmem>>, vector<1x1x32xf32>
    %243 = vector.shape_cast %242 : vector<1x1x32xf32> to vector<1x32xf32>
    %c48_183 = arith.constant 48 : index
    %c0_184 = arith.constant 0 : index
    %244 = vector.load %arg8[%c48_183, %c0_184] : memref<64x32xf32, #tpu.memory_space<vmem>>, vector<1x32xf32>
    tpu.vector_store %arg8[%c48_183, %c0_184], %243 {strides = array<i32>} : memref<64x32xf32, #tpu.memory_space<vmem>>, vector<1x32xf32>,
    %c14_185 = arith.constant 14 : index
    %245 = memref.load %arg0[%c14_185] : memref<64xi32, #tpu.memory_space<smem>>
    %246 = arith.index_cast %245 : i32 to index
    %c0_186 = arith.constant 0 : index
    %c0_187 = arith.constant 0 : index
    %247 = vector.load %arg1[%246, %c0_186, %c0_187] : memref<50x1x32xf32, #tpu.memory_space<vmem>>, vector<1x1x32xf32>
    %248 = vector.shape_cast %247 : vector<1x1x32xf32> to vector<1x32xf32>
    %c49_188 = arith.constant 49 : index
    %c0_189 = arith.constant 0 : index
    %249 = vector.load %arg8[%c49_188, %c0_189] : memref<64x32xf32, #tpu.memory_space<vmem>>, vector<1x32xf32>
    tpu.vector_store %arg8[%c49_188, %c0_189], %248 {strides = array<i32>} : memref<64x32xf32, #tpu.memory_space<vmem>>, vector<1x32xf32>,
    %c22_190 = arith.constant 22 : index
    %250 = memref.load %arg0[%c22_190] : memref<64xi32, #tpu.memory_space<smem>>
    %251 = arith.index_cast %250 : i32 to index
    %c0_191 = arith.constant 0 : index
    %c0_192 = arith.constant 0 : index
    %252 = vector.load %arg1[%251, %c0_191, %c0_192] : memref<50x1x32xf32, #tpu.memory_space<vmem>>, vector<1x1x32xf32>
    %253 = vector.shape_cast %252 : vector<1x1x32xf32> to vector<1x32xf32>
    %c50_193 = arith.constant 50 : index
    %c0_194 = arith.constant 0 : index
    %254 = vector.load %arg8[%c50_193, %c0_194] : memref<64x32xf32, #tpu.memory_space<vmem>>, vector<1x32xf32>
    tpu.vector_store %arg8[%c50_193, %c0_194], %253 {strides = array<i32>} : memref<64x32xf32, #tpu.memory_space<vmem>>, vector<1x32xf32>,
    %c30_195 = arith.constant 30 : index
    %255 = memref.load %arg0[%c30_195] : memref<64xi32, #tpu.memory_space<smem>>
    %256 = arith.index_cast %255 : i32 to index
    %c0_196 = arith.constant 0 : index
    %c0_197 = arith.constant 0 : index
    %257 = vector.load %arg1[%256, %c0_196, %c0_197] : memref<50x1x32xf32, #tpu.memory_space<vmem>>, vector<1x1x32xf32>
    %258 = vector.shape_cast %257 : vector<1x1x32xf32> to vector<1x32xf32>
    %c51_198 = arith.constant 51 : index
    %c0_199 = arith.constant 0 : index
    %259 = vector.load %arg8[%c51_198, %c0_199] : memref<64x32xf32, #tpu.memory_space<vmem>>, vector<1x32xf32>
    tpu.vector_store %arg8[%c51_198, %c0_199], %258 {strides = array<i32>} : memref<64x32xf32, #tpu.memory_space<vmem>>, vector<1x32xf32>,
    %c38_200 = arith.constant 38 : index
    %260 = memref.load %arg0[%c38_200] : memref<64xi32, #tpu.memory_space<smem>>
    %261 = arith.index_cast %260 : i32 to index
    %c0_201 = arith.constant 0 : index
    %c0_202 = arith.constant 0 : index
    %262 = vector.load %arg1[%261, %c0_201, %c0_202] : memref<50x1x32xf32, #tpu.memory_space<vmem>>, vector<1x1x32xf32>
    %263 = vector.shape_cast %262 : vector<1x1x32xf32> to vector<1x32xf32>
    %c52_203 = arith.constant 52 : index
    %c0_204 = arith.constant 0 : index
    %264 = vector.load %arg8[%c52_203, %c0_204] : memref<64x32xf32, #tpu.memory_space<vmem>>, vector<1x32xf32>
    tpu.vector_store %arg8[%c52_203, %c0_204], %263 {strides = array<i32>} : memref<64x32xf32, #tpu.memory_space<vmem>>, vector<1x32xf32>,
    %c46_205 = arith.constant 46 : index
    %265 = memref.load %arg0[%c46_205] : memref<64xi32, #tpu.memory_space<smem>>
    %266 = arith.index_cast %265 : i32 to index
    %c0_206 = arith.constant 0 : index
    %c0_207 = arith.constant 0 : index
    %267 = vector.load %arg1[%266, %c0_206, %c0_207] : memref<50x1x32xf32, #tpu.memory_space<vmem>>, vector<1x1x32xf32>
    %268 = vector.shape_cast %267 : vector<1x1x32xf32> to vector<1x32xf32>
    %c53_208 = arith.constant 53 : index
    %c0_209 = arith.constant 0 : index
    %269 = vector.load %arg8[%c53_208, %c0_209] : memref<64x32xf32, #tpu.memory_space<vmem>>, vector<1x32xf32>
    tpu.vector_store %arg8[%c53_208, %c0_209], %268 {strides = array<i32>} : memref<64x32xf32, #tpu.memory_space<vmem>>, vector<1x32xf32>,
    %c54 = arith.constant 54 : index
    %270 = memref.load %arg0[%c54] : memref<64xi32, #tpu.memory_space<smem>>
    %271 = arith.index_cast %270 : i32 to index
    %c0_210 = arith.constant 0 : index
    %c0_211 = arith.constant 0 : index
    %272 = vector.load %arg1[%271, %c0_210, %c0_211] : memref<50x1x32xf32, #tpu.memory_space<vmem>>, vector<1x1x32xf32>
    %273 = vector.shape_cast %272 : vector<1x1x32xf32> to vector<1x32xf32>
    %c54_212 = arith.constant 54 : index
    %c0_213 = arith.constant 0 : index
    %274 = vector.load %arg8[%c54_212, %c0_213] : memref<64x32xf32, #tpu.memory_space<vmem>>, vector<1x32xf32>
    tpu.vector_store %arg8[%c54_212, %c0_213], %273 {strides = array<i32>} : memref<64x32xf32, #tpu.memory_space<vmem>>, vector<1x32xf32>,
    %c62 = arith.constant 62 : index
    %275 = memref.load %arg0[%c62] : memref<64xi32, #tpu.memory_space<smem>>
    %276 = arith.index_cast %275 : i32 to index
    %c0_214 = arith.constant 0 : index
    %c0_215 = arith.constant 0 : index
    %277 = vector.load %arg1[%276, %c0_214, %c0_215] : memref<50x1x32xf32, #tpu.memory_space<vmem>>, vector<1x1x32xf32>
    %278 = vector.shape_cast %277 : vector<1x1x32xf32> to vector<1x32xf32>
    %c55 = arith.constant 55 : index
    %c0_216 = arith.constant 0 : index
    %279 = vector.load %arg8[%c55, %c0_216] : memref<64x32xf32, #tpu.memory_space<vmem>>, vector<1x32xf32>
    tpu.vector_store %arg8[%c55, %c0_216], %278 {strides = array<i32>} : memref<64x32xf32, #tpu.memory_space<vmem>>, vector<1x32xf32>,
    %c7_217 = arith.constant 7 : index
    %280 = memref.load %arg0[%c7_217] : memref<64xi32, #tpu.memory_space<smem>>
    %281 = arith.index_cast %280 : i32 to index
    %c0_218 = arith.constant 0 : index
    %c0_219 = arith.constant 0 : index
    %282 = vector.load %arg1[%281, %c0_218, %c0_219] : memref<50x1x32xf32, #tpu.memory_space<vmem>>, vector<1x1x32xf32>
    %283 = vector.shape_cast %282 : vector<1x1x32xf32> to vector<1x32xf32>
    %c56_220 = arith.constant 56 : index
    %c0_221 = arith.constant 0 : index
    %284 = vector.load %arg8[%c56_220, %c0_221] : memref<64x32xf32, #tpu.memory_space<vmem>>, vector<1x32xf32>
    tpu.vector_store %arg8[%c56_220, %c0_221], %283 {strides = array<i32>} : memref<64x32xf32, #tpu.memory_space<vmem>>, vector<1x32xf32>,
    %c15_222 = arith.constant 15 : index
    %285 = memref.load %arg0[%c15_222] : memref<64xi32, #tpu.memory_space<smem>>
    %286 = arith.index_cast %285 : i32 to index
    %c0_223 = arith.constant 0 : index
    %c0_224 = arith.constant 0 : index
    %287 = vector.load %arg1[%286, %c0_223, %c0_224] : memref<50x1x32xf32, #tpu.memory_space<vmem>>, vector<1x1x32xf32>
    %288 = vector.shape_cast %287 : vector<1x1x32xf32> to vector<1x32xf32>
    %c57_225 = arith.constant 57 : index
    %c0_226 = arith.constant 0 : index
    %289 = vector.load %arg8[%c57_225, %c0_226] : memref<64x32xf32, #tpu.memory_space<vmem>>, vector<1x32xf32>
    tpu.vector_store %arg8[%c57_225, %c0_226], %288 {strides = array<i32>} : memref<64x32xf32, #tpu.memory_space<vmem>>, vector<1x32xf32>,
    %c23_227 = arith.constant 23 : index
    %290 = memref.load %arg0[%c23_227] : memref<64xi32, #tpu.memory_space<smem>>
    %291 = arith.index_cast %290 : i32 to index
    %c0_228 = arith.constant 0 : index
    %c0_229 = arith.constant 0 : index
    %292 = vector.load %arg1[%291, %c0_228, %c0_229] : memref<50x1x32xf32, #tpu.memory_space<vmem>>, vector<1x1x32xf32>
    %293 = vector.shape_cast %292 : vector<1x1x32xf32> to vector<1x32xf32>
    %c58_230 = arith.constant 58 : index
    %c0_231 = arith.constant 0 : index
    %294 = vector.load %arg8[%c58_230, %c0_231] : memref<64x32xf32, #tpu.memory_space<vmem>>, vector<1x32xf32>
    tpu.vector_store %arg8[%c58_230, %c0_231], %293 {strides = array<i32>} : memref<64x32xf32, #tpu.memory_space<vmem>>, vector<1x32xf32>,
    %c31_232 = arith.constant 31 : index
    %295 = memref.load %arg0[%c31_232] : memref<64xi32, #tpu.memory_space<smem>>
    %296 = arith.index_cast %295 : i32 to index
    %c0_233 = arith.constant 0 : index
    %c0_234 = arith.constant 0 : index
    %297 = vector.load %arg1[%296, %c0_233, %c0_234] : memref<50x1x32xf32, #tpu.memory_space<vmem>>, vector<1x1x32xf32>
    %298 = vector.shape_cast %297 : vector<1x1x32xf32> to vector<1x32xf32>
    %c59_235 = arith.constant 59 : index
    %c0_236 = arith.constant 0 : index
    %299 = vector.load %arg8[%c59_235, %c0_236] : memref<64x32xf32, #tpu.memory_space<vmem>>, vector<1x32xf32>
    tpu.vector_store %arg8[%c59_235, %c0_236], %298 {strides = array<i32>} : memref<64x32xf32, #tpu.memory_space<vmem>>, vector<1x32xf32>,
    %c39_237 = arith.constant 39 : index
    %300 = memref.load %arg0[%c39_237] : memref<64xi32, #tpu.memory_space<smem>>
    %301 = arith.index_cast %300 : i32 to index
    %c0_238 = arith.constant 0 : index
    %c0_239 = arith.constant 0 : index
    %302 = vector.load %arg1[%301, %c0_238, %c0_239] : memref<50x1x32xf32, #tpu.memory_space<vmem>>, vector<1x1x32xf32>
    %303 = vector.shape_cast %302 : vector<1x1x32xf32> to vector<1x32xf32>
    %c60_240 = arith.constant 60 : index
    %c0_241 = arith.constant 0 : index
    %304 = vector.load %arg8[%c60_240, %c0_241] : memref<64x32xf32, #tpu.memory_space<vmem>>, vector<1x32xf32>
    tpu.vector_store %arg8[%c60_240, %c0_241], %303 {strides = array<i32>} : memref<64x32xf32, #tpu.memory_space<vmem>>, vector<1x32xf32>,
    %c47_242 = arith.constant 47 : index
    %305 = memref.load %arg0[%c47_242] : memref<64xi32, #tpu.memory_space<smem>>
    %306 = arith.index_cast %305 : i32 to index
    %c0_243 = arith.constant 0 : index
    %c0_244 = arith.constant 0 : index
    %307 = vector.load %arg1[%306, %c0_243, %c0_244] : memref<50x1x32xf32, #tpu.memory_space<vmem>>, vector<1x1x32xf32>
    %308 = vector.shape_cast %307 : vector<1x1x32xf32> to vector<1x32xf32>
    %c61_245 = arith.constant 61 : index
    %c0_246 = arith.constant 0 : index
    %309 = vector.load %arg8[%c61_245, %c0_246] : memref<64x32xf32, #tpu.memory_space<vmem>>, vector<1x32xf32>
    tpu.vector_store %arg8[%c61_245, %c0_246], %308 {strides = array<i32>} : memref<64x32xf32, #tpu.memory_space<vmem>>, vector<1x32xf32>,
    %c55_247 = arith.constant 55 : index
    %310 = memref.load %arg0[%c55_247] : memref<64xi32, #tpu.memory_space<smem>>
    %311 = arith.index_cast %310 : i32 to index
    %c0_248 = arith.constant 0 : index
    %c0_249 = arith.constant 0 : index
    %312 = vector.load %arg1[%311, %c0_248, %c0_249] : memref<50x1x32xf32, #tpu.memory_space<vmem>>, vector<1x1x32xf32>
    %313 = vector.shape_cast %312 : vector<1x1x32xf32> to vector<1x32xf32>
    %c62_250 = arith.constant 62 : index
    %c0_251 = arith.constant 0 : index
    %314 = vector.load %arg8[%c62_250, %c0_251] : memref<64x32xf32, #tpu.memory_space<vmem>>, vector<1x32xf32>
    tpu.vector_store %arg8[%c62_250, %c0_251], %313 {strides = array<i32>} : memref<64x32xf32, #tpu.memory_space<vmem>>, vector<1x32xf32>,
    %c63 = arith.constant 63 : index
    %315 = memref.load %arg0[%c63] : memref<64xi32, #tpu.memory_space<smem>>
    %316 = arith.index_cast %315 : i32 to index
    %c0_252 = arith.constant 0 : index
    %c0_253 = arith.constant 0 : index
    %317 = vector.load %arg1[%316, %c0_252, %c0_253] : memref<50x1x32xf32, #tpu.memory_space<vmem>>, vector<1x1x32xf32>
    %318 = vector.shape_cast %317 : vector<1x1x32xf32> to vector<1x32xf32>
    %c63_254 = arith.constant 63 : index
    %c0_255 = arith.constant 0 : index
    %319 = vector.load %arg8[%c63_254, %c0_255] : memref<64x32xf32, #tpu.memory_space<vmem>>, vector<1x32xf32>
    tpu.vector_store %arg8[%c63_254, %c0_255], %318 {strides = array<i32>} : memref<64x32xf32, #tpu.memory_space<vmem>>, vector<1x32xf32>,
    %c0_256 = arith.constant 0 : index
    %c0_257 = arith.constant 0 : index
    %320 = vector.load %arg2[%c0_256, %c0_257] : memref<32x128xf32, #tpu.memory_space<vmem>>, vector<32x128xf32>
    %c0_258 = arith.constant 0 : index
    %c0_259 = arith.constant 0 : index
    %321 = vector.load %arg3[%c0_258, %c0_259] : memref<32x128xf32, #tpu.memory_space<vmem>>, vector<32x128xf32>
    %c0_260 = arith.constant 0 : index
    %c0_261 = arith.constant 0 : index
    %322 = vector.load %arg4[%c0_260, %c0_261] : memref<1x128xf32, #tpu.memory_space<vmem>>, vector<1x128xf32>
    %c0_262 = arith.constant 0 : index
    %c0_263 = arith.constant 0 : index
    %323 = vector.load %arg8[%c0_262, %c0_263] : memref<64x32xf32, #tpu.memory_space<vmem>>, vector<64x32xf32>
    %cst = arith.constant dense<0.000000e+00> : vector<64x128xf32>
    %324 = tpu.matmul %323, %320, %cst {dimension_numbers = #tpu.dot_dimension_numbers<[1], [0], [0], [1], [0, 0, 1, 1], [], []>} : vector<64x32xf32>, vector<32x128xf32>, vector<64x128xf32> -> vector<64x128xf32>
    %325 = vector.broadcast %322 : vector<1x128xf32> to vector<64x128xf32>
    %326 = arith.addf %324, %325 : vector<64x128xf32>
    %cst_264 = arith.constant 0.000000e+00 : f32
    %327 = vector.broadcast %cst_264 : f32 to vector<8x32xf32>
    %cst_265 = arith.constant 0.000000e+00 : f32
    %328 = vector.broadcast %cst_265 : f32 to vector<8x32xf32>
    %329 = vector.extract_strided_slice %326 {offsets = [0, 0], sizes = [8, 128], strides = [1, 1]} : vector<64x128xf32> to vector<8x128xf32>
    %cst_266 = arith.constant dense<0.000000e+00> : vector<8x128xf32>
    %330 = tpu.matmul %327, %321, %cst_266 {dimension_numbers = #tpu.dot_dimension_numbers<[1], [0], [0], [1], [0, 0, 1, 1], [], []>} : vector<8x32xf32>, vector<32x128xf32>, vector<8x128xf32> -> vector<8x128xf32>
    %331 = arith.addf %329, %330 : vector<8x128xf32>
    %332 = vector.extract_strided_slice %331 {offsets = [0, 0], sizes = [8, 96], strides = [1, 1]} : vector<8x128xf32> to vector<8x96xf32>
    %333 = arith.negf %332 : vector<8x96xf32>
    %334 = math.exp %333 : vector<8x96xf32>
    %cst_267 = arith.constant 1.000000e+00 : f32
    %335 = vector.broadcast %cst_267 : f32 to vector<8x96xf32>
    %336 = arith.addf %335, %334 : vector<8x96xf32>
    %337 = arith.divf %335, %336 : vector<8x96xf32>
    %338 = vector.extract_strided_slice %337 {offsets = [0, 0], sizes = [8, 32], strides = [1, 1]} : vector<8x96xf32> to vector<8x32xf32>
    %339 = vector.extract_strided_slice %337 {offsets = [0, 32], sizes = [8, 32], strides = [1, 1]} : vector<8x96xf32> to vector<8x32xf32>
    %340 = vector.extract_strided_slice %337 {offsets = [0, 64], sizes = [8, 32], strides = [1, 1]} : vector<8x96xf32> to vector<8x32xf32>
    %341 = vector.extract_strided_slice %331 {offsets = [0, 96], sizes = [8, 32], strides = [1, 1]} : vector<8x128xf32> to vector<8x32xf32>
    %342 = math.tanh %341 : vector<8x32xf32>
    %343 = arith.mulf %339, %328 : vector<8x32xf32>
    %344 = arith.mulf %338, %342 : vector<8x32xf32>
    %345 = arith.addf %343, %344 : vector<8x32xf32>
    %346 = math.tanh %345 : vector<8x32xf32>
    %347 = arith.mulf %340, %346 : vector<8x32xf32>
    %348 = vector.extract_strided_slice %326 {offsets = [8, 0], sizes = [8, 128], strides = [1, 1]} : vector<64x128xf32> to vector<8x128xf32>
    %cst_268 = arith.constant dense<0.000000e+00> : vector<8x128xf32>
    %349 = tpu.matmul %347, %321, %cst_268 {dimension_numbers = #tpu.dot_dimension_numbers<[1], [0], [0], [1], [0, 0, 1, 1], [], []>} : vector<8x32xf32>, vector<32x128xf32>, vector<8x128xf32> -> vector<8x128xf32>
    %350 = arith.addf %348, %349 : vector<8x128xf32>
    %351 = vector.extract_strided_slice %350 {offsets = [0, 0], sizes = [8, 96], strides = [1, 1]} : vector<8x128xf32> to vector<8x96xf32>
    %352 = arith.negf %351 : vector<8x96xf32>
    %353 = math.exp %352 : vector<8x96xf32>
    %cst_269 = arith.constant 1.000000e+00 : f32
    %354 = vector.broadcast %cst_269 : f32 to vector<8x96xf32>
    %355 = arith.addf %354, %353 : vector<8x96xf32>
    %356 = arith.divf %354, %355 : vector<8x96xf32>
    %357 = vector.extract_strided_slice %356 {offsets = [0, 0], sizes = [8, 32], strides = [1, 1]} : vector<8x96xf32> to vector<8x32xf32>
    %358 = vector.extract_strided_slice %356 {offsets = [0, 32], sizes = [8, 32], strides = [1, 1]} : vector<8x96xf32> to vector<8x32xf32>
    %359 = vector.extract_strided_slice %356 {offsets = [0, 64], sizes = [8, 32], strides = [1, 1]} : vector<8x96xf32> to vector<8x32xf32>
    %360 = vector.extract_strided_slice %350 {offsets = [0, 96], sizes = [8, 32], strides = [1, 1]} : vector<8x128xf32> to vector<8x32xf32>
    %361 = math.tanh %360 : vector<8x32xf32>
    %362 = arith.mulf %358, %345 : vector<8x32xf32>
    %363 = arith.mulf %357, %361 : vector<8x32xf32>
    %364 = arith.addf %362, %363 : vector<8x32xf32>
    %365 = math.tanh %364 : vector<8x32xf32>
    %366 = arith.mulf %359, %365 : vector<8x32xf32>
    %367 = vector.extract_strided_slice %326 {offsets = [16, 0], sizes = [8, 128], strides = [1, 1]} : vector<64x128xf32> to vector<8x128xf32>
    %cst_270 = arith.constant dense<0.000000e+00> : vector<8x128xf32>
    %368 = tpu.matmul %366, %321, %cst_270 {dimension_numbers = #tpu.dot_dimension_numbers<[1], [0], [0], [1], [0, 0, 1, 1], [], []>} : vector<8x32xf32>, vector<32x128xf32>, vector<8x128xf32> -> vector<8x128xf32>
    %369 = arith.addf %367, %368 : vector<8x128xf32>
    %370 = vector.extract_strided_slice %369 {offsets = [0, 0], sizes = [8, 96], strides = [1, 1]} : vector<8x128xf32> to vector<8x96xf32>
    %371 = arith.negf %370 : vector<8x96xf32>
    %372 = math.exp %371 : vector<8x96xf32>
    %cst_271 = arith.constant 1.000000e+00 : f32
    %373 = vector.broadcast %cst_271 : f32 to vector<8x96xf32>
    %374 = arith.addf %373, %372 : vector<8x96xf32>
    %375 = arith.divf %373, %374 : vector<8x96xf32>
    %376 = vector.extract_strided_slice %375 {offsets = [0, 0], sizes = [8, 32], strides = [1, 1]} : vector<8x96xf32> to vector<8x32xf32>
    %377 = vector.extract_strided_slice %375 {offsets = [0, 32], sizes = [8, 32], strides = [1, 1]} : vector<8x96xf32> to vector<8x32xf32>
    %378 = vector.extract_strided_slice %375 {offsets = [0, 64], sizes = [8, 32], strides = [1, 1]} : vector<8x96xf32> to vector<8x32xf32>
    %379 = vector.extract_strided_slice %369 {offsets = [0, 96], sizes = [8, 32], strides = [1, 1]} : vector<8x128xf32> to vector<8x32xf32>
    %380 = math.tanh %379 : vector<8x32xf32>
    %381 = arith.mulf %377, %364 : vector<8x32xf32>
    %382 = arith.mulf %376, %380 : vector<8x32xf32>
    %383 = arith.addf %381, %382 : vector<8x32xf32>
    %384 = math.tanh %383 : vector<8x32xf32>
    %385 = arith.mulf %378, %384 : vector<8x32xf32>
    %386 = vector.extract_strided_slice %326 {offsets = [24, 0], sizes = [8, 128], strides = [1, 1]} : vector<64x128xf32> to vector<8x128xf32>
    %cst_272 = arith.constant dense<0.000000e+00> : vector<8x128xf32>
    %387 = tpu.matmul %385, %321, %cst_272 {dimension_numbers = #tpu.dot_dimension_numbers<[1], [0], [0], [1], [0, 0, 1, 1], [], []>} : vector<8x32xf32>, vector<32x128xf32>, vector<8x128xf32> -> vector<8x128xf32>
    %388 = arith.addf %386, %387 : vector<8x128xf32>
    %389 = vector.extract_strided_slice %388 {offsets = [0, 0], sizes = [8, 96], strides = [1, 1]} : vector<8x128xf32> to vector<8x96xf32>
    %390 = arith.negf %389 : vector<8x96xf32>
    %391 = math.exp %390 : vector<8x96xf32>
    %cst_273 = arith.constant 1.000000e+00 : f32
    %392 = vector.broadcast %cst_273 : f32 to vector<8x96xf32>
    %393 = arith.addf %392, %391 : vector<8x96xf32>
    %394 = arith.divf %392, %393 : vector<8x96xf32>
    %395 = vector.extract_strided_slice %394 {offsets = [0, 0], sizes = [8, 32], strides = [1, 1]} : vector<8x96xf32> to vector<8x32xf32>
    %396 = vector.extract_strided_slice %394 {offsets = [0, 32], sizes = [8, 32], strides = [1, 1]} : vector<8x96xf32> to vector<8x32xf32>
    %397 = vector.extract_strided_slice %394 {offsets = [0, 64], sizes = [8, 32], strides = [1, 1]} : vector<8x96xf32> to vector<8x32xf32>
    %398 = vector.extract_strided_slice %388 {offsets = [0, 96], sizes = [8, 32], strides = [1, 1]} : vector<8x128xf32> to vector<8x32xf32>
    %399 = math.tanh %398 : vector<8x32xf32>
    %400 = arith.mulf %396, %383 : vector<8x32xf32>
    %401 = arith.mulf %395, %399 : vector<8x32xf32>
    %402 = arith.addf %400, %401 : vector<8x32xf32>
    %403 = math.tanh %402 : vector<8x32xf32>
    %404 = arith.mulf %397, %403 : vector<8x32xf32>
    %405 = vector.extract_strided_slice %326 {offsets = [32, 0], sizes = [8, 128], strides = [1, 1]} : vector<64x128xf32> to vector<8x128xf32>
    %cst_274 = arith.constant dense<0.000000e+00> : vector<8x128xf32>
    %406 = tpu.matmul %404, %321, %cst_274 {dimension_numbers = #tpu.dot_dimension_numbers<[1], [0], [0], [1], [0, 0, 1, 1], [], []>} : vector<8x32xf32>, vector<32x128xf32>, vector<8x128xf32> -> vector<8x128xf32>
    %407 = arith.addf %405, %406 : vector<8x128xf32>
    %408 = vector.extract_strided_slice %407 {offsets = [0, 0], sizes = [8, 96], strides = [1, 1]} : vector<8x128xf32> to vector<8x96xf32>
    %409 = arith.negf %408 : vector<8x96xf32>
    %410 = math.exp %409 : vector<8x96xf32>
    %cst_275 = arith.constant 1.000000e+00 : f32
    %411 = vector.broadcast %cst_275 : f32 to vector<8x96xf32>
    %412 = arith.addf %411, %410 : vector<8x96xf32>
    %413 = arith.divf %411, %412 : vector<8x96xf32>
    %414 = vector.extract_strided_slice %413 {offsets = [0, 0], sizes = [8, 32], strides = [1, 1]} : vector<8x96xf32> to vector<8x32xf32>
    %415 = vector.extract_strided_slice %413 {offsets = [0, 32], sizes = [8, 32], strides = [1, 1]} : vector<8x96xf32> to vector<8x32xf32>
    %416 = vector.extract_strided_slice %413 {offsets = [0, 64], sizes = [8, 32], strides = [1, 1]} : vector<8x96xf32> to vector<8x32xf32>
    %417 = vector.extract_strided_slice %407 {offsets = [0, 96], sizes = [8, 32], strides = [1, 1]} : vector<8x128xf32> to vector<8x32xf32>
    %418 = math.tanh %417 : vector<8x32xf32>
    %419 = arith.mulf %415, %402 : vector<8x32xf32>
    %420 = arith.mulf %414, %418 : vector<8x32xf32>
    %421 = arith.addf %419, %420 : vector<8x32xf32>
    %422 = math.tanh %421 : vector<8x32xf32>
    %423 = arith.mulf %416, %422 : vector<8x32xf32>
    %424 = vector.extract_strided_slice %326 {offsets = [40, 0], sizes = [8, 128], strides = [1, 1]} : vector<64x128xf32> to vector<8x128xf32>
    %cst_276 = arith.constant dense<0.000000e+00> : vector<8x128xf32>
    %425 = tpu.matmul %423, %321, %cst_276 {dimension_numbers = #tpu.dot_dimension_numbers<[1], [0], [0], [1], [0, 0, 1, 1], [], []>} : vector<8x32xf32>, vector<32x128xf32>, vector<8x128xf32> -> vector<8x128xf32>
    %426 = arith.addf %424, %425 : vector<8x128xf32>
    %427 = vector.extract_strided_slice %426 {offsets = [0, 0], sizes = [8, 96], strides = [1, 1]} : vector<8x128xf32> to vector<8x96xf32>
    %428 = arith.negf %427 : vector<8x96xf32>
    %429 = math.exp %428 : vector<8x96xf32>
    %cst_277 = arith.constant 1.000000e+00 : f32
    %430 = vector.broadcast %cst_277 : f32 to vector<8x96xf32>
    %431 = arith.addf %430, %429 : vector<8x96xf32>
    %432 = arith.divf %430, %431 : vector<8x96xf32>
    %433 = vector.extract_strided_slice %432 {offsets = [0, 0], sizes = [8, 32], strides = [1, 1]} : vector<8x96xf32> to vector<8x32xf32>
    %434 = vector.extract_strided_slice %432 {offsets = [0, 32], sizes = [8, 32], strides = [1, 1]} : vector<8x96xf32> to vector<8x32xf32>
    %435 = vector.extract_strided_slice %432 {offsets = [0, 64], sizes = [8, 32], strides = [1, 1]} : vector<8x96xf32> to vector<8x32xf32>
    %436 = vector.extract_strided_slice %426 {offsets = [0, 96], sizes = [8, 32], strides = [1, 1]} : vector<8x128xf32> to vector<8x32xf32>
    %437 = math.tanh %436 : vector<8x32xf32>
    %438 = arith.mulf %434, %421 : vector<8x32xf32>
    %439 = arith.mulf %433, %437 : vector<8x32xf32>
    %440 = arith.addf %438, %439 : vector<8x32xf32>
    %441 = math.tanh %440 : vector<8x32xf32>
    %442 = arith.mulf %435, %441 : vector<8x32xf32>
    %443 = vector.extract_strided_slice %326 {offsets = [48, 0], sizes = [8, 128], strides = [1, 1]} : vector<64x128xf32> to vector<8x128xf32>
    %cst_278 = arith.constant dense<0.000000e+00> : vector<8x128xf32>
    %444 = tpu.matmul %442, %321, %cst_278 {dimension_numbers = #tpu.dot_dimension_numbers<[1], [0], [0], [1], [0, 0, 1, 1], [], []>} : vector<8x32xf32>, vector<32x128xf32>, vector<8x128xf32> -> vector<8x128xf32>
    %445 = arith.addf %443, %444 : vector<8x128xf32>
    %446 = vector.extract_strided_slice %445 {offsets = [0, 0], sizes = [8, 96], strides = [1, 1]} : vector<8x128xf32> to vector<8x96xf32>
    %447 = arith.negf %446 : vector<8x96xf32>
    %448 = math.exp %447 : vector<8x96xf32>
    %cst_279 = arith.constant 1.000000e+00 : f32
    %449 = vector.broadcast %cst_279 : f32 to vector<8x96xf32>
    %450 = arith.addf %449, %448 : vector<8x96xf32>
    %451 = arith.divf %449, %450 : vector<8x96xf32>
    %452 = vector.extract_strided_slice %451 {offsets = [0, 0], sizes = [8, 32], strides = [1, 1]} : vector<8x96xf32> to vector<8x32xf32>
    %453 = vector.extract_strided_slice %451 {offsets = [0, 32], sizes = [8, 32], strides = [1, 1]} : vector<8x96xf32> to vector<8x32xf32>
    %454 = vector.extract_strided_slice %451 {offsets = [0, 64], sizes = [8, 32], strides = [1, 1]} : vector<8x96xf32> to vector<8x32xf32>
    %455 = vector.extract_strided_slice %445 {offsets = [0, 96], sizes = [8, 32], strides = [1, 1]} : vector<8x128xf32> to vector<8x32xf32>
    %456 = math.tanh %455 : vector<8x32xf32>
    %457 = arith.mulf %453, %440 : vector<8x32xf32>
    %458 = arith.mulf %452, %456 : vector<8x32xf32>
    %459 = arith.addf %457, %458 : vector<8x32xf32>
    %460 = math.tanh %459 : vector<8x32xf32>
    %461 = arith.mulf %454, %460 : vector<8x32xf32>
    %462 = vector.extract_strided_slice %326 {offsets = [56, 0], sizes = [8, 128], strides = [1, 1]} : vector<64x128xf32> to vector<8x128xf32>
    %cst_280 = arith.constant dense<0.000000e+00> : vector<8x128xf32>
    %463 = tpu.matmul %461, %321, %cst_280 {dimension_numbers = #tpu.dot_dimension_numbers<[1], [0], [0], [1], [0, 0, 1, 1], [], []>} : vector<8x32xf32>, vector<32x128xf32>, vector<8x128xf32> -> vector<8x128xf32>
    %464 = arith.addf %462, %463 : vector<8x128xf32>
    %465 = vector.extract_strided_slice %464 {offsets = [0, 0], sizes = [8, 96], strides = [1, 1]} : vector<8x128xf32> to vector<8x96xf32>
    %466 = arith.negf %465 : vector<8x96xf32>
    %467 = math.exp %466 : vector<8x96xf32>
    %cst_281 = arith.constant 1.000000e+00 : f32
    %468 = vector.broadcast %cst_281 : f32 to vector<8x96xf32>
    %469 = arith.addf %468, %467 : vector<8x96xf32>
    %470 = arith.divf %468, %469 : vector<8x96xf32>
    %471 = vector.extract_strided_slice %470 {offsets = [0, 0], sizes = [8, 32], strides = [1, 1]} : vector<8x96xf32> to vector<8x32xf32>
    %472 = vector.extract_strided_slice %470 {offsets = [0, 32], sizes = [8, 32], strides = [1, 1]} : vector<8x96xf32> to vector<8x32xf32>
    %473 = vector.extract_strided_slice %470 {offsets = [0, 64], sizes = [8, 32], strides = [1, 1]} : vector<8x96xf32> to vector<8x32xf32>
    %474 = vector.extract_strided_slice %464 {offsets = [0, 96], sizes = [8, 32], strides = [1, 1]} : vector<8x128xf32> to vector<8x32xf32>
    %475 = math.tanh %474 : vector<8x32xf32>
    %476 = arith.mulf %472, %459 : vector<8x32xf32>
    %477 = arith.mulf %471, %475 : vector<8x32xf32>
    %478 = arith.addf %476, %477 : vector<8x32xf32>
    %479 = math.tanh %478 : vector<8x32xf32>
    %480 = arith.mulf %473, %479 : vector<8x32xf32>
    %481 = arith.mulf %347, %480 : vector<8x32xf32>
    %cst_282 = arith.constant dense<0.000000e+00> : vector<8xf32>
    %482 = vector.multi_reduction <add>, %481, %cst_282 [1] : vector<8x32xf32> to vector<8xf32>
    %483 = vector.shape_cast %482 : vector<8xf32> to vector<8x1xf32>
    %484 = arith.mulf %366, %480 : vector<8x32xf32>
    %cst_283 = arith.constant dense<0.000000e+00> : vector<8xf32>
    %485 = vector.multi_reduction <add>, %484, %cst_283 [1] : vector<8x32xf32> to vector<8xf32>
    %486 = vector.shape_cast %485 : vector<8xf32> to vector<8x1xf32>
    %487 = arith.mulf %385, %480 : vector<8x32xf32>
    %cst_284 = arith.constant dense<0.000000e+00> : vector<8xf32>
    %488 = vector.multi_reduction <add>, %487, %cst_284 [1] : vector<8x32xf32> to vector<8xf32>
    %489 = vector.shape_cast %488 : vector<8xf32> to vector<8x1xf32>
    %490 = arith.mulf %404, %480 : vector<8x32xf32>
    %cst_285 = arith.constant dense<0.000000e+00> : vector<8xf32>
    %491 = vector.multi_reduction <add>, %490, %cst_285 [1] : vector<8x32xf32> to vector<8xf32>
    %492 = vector.shape_cast %491 : vector<8xf32> to vector<8x1xf32>
    %493 = arith.mulf %423, %480 : vector<8x32xf32>
    %cst_286 = arith.constant dense<0.000000e+00> : vector<8xf32>
    %494 = vector.multi_reduction <add>, %493, %cst_286 [1] : vector<8x32xf32> to vector<8xf32>
    %495 = vector.shape_cast %494 : vector<8xf32> to vector<8x1xf32>
    %496 = arith.mulf %442, %480 : vector<8x32xf32>
    %cst_287 = arith.constant dense<0.000000e+00> : vector<8xf32>
    %497 = vector.multi_reduction <add>, %496, %cst_287 [1] : vector<8x32xf32> to vector<8xf32>
    %498 = vector.shape_cast %497 : vector<8xf32> to vector<8x1xf32>
    %499 = arith.mulf %461, %480 : vector<8x32xf32>
    %cst_288 = arith.constant dense<0.000000e+00> : vector<8xf32>
    %500 = vector.multi_reduction <add>, %499, %cst_288 [1] : vector<8x32xf32> to vector<8xf32>
    %501 = vector.shape_cast %500 : vector<8xf32> to vector<8x1xf32>
    %502 = arith.mulf %480, %480 : vector<8x32xf32>
    %cst_289 = arith.constant dense<0.000000e+00> : vector<8xf32>
    %503 = vector.multi_reduction <add>, %502, %cst_289 [1] : vector<8x32xf32> to vector<8xf32>
    %504 = vector.shape_cast %503 : vector<8xf32> to vector<8x1xf32>
    %505 = arith.maximumf %483, %486 : vector<8x1xf32>
    %506 = arith.maximumf %505, %489 : vector<8x1xf32>
    %507 = arith.maximumf %506, %492 : vector<8x1xf32>
    %508 = arith.maximumf %507, %495 : vector<8x1xf32>
    %509 = arith.maximumf %508, %498 : vector<8x1xf32>
    %510 = arith.maximumf %509, %501 : vector<8x1xf32>
    %511 = arith.maximumf %510, %504 : vector<8x1xf32>
    %512 = arith.subf %483, %511 : vector<8x1xf32>
    %513 = math.exp %512 : vector<8x1xf32>
    %514 = arith.subf %486, %511 : vector<8x1xf32>
    %515 = math.exp %514 : vector<8x1xf32>
    %516 = arith.subf %489, %511 : vector<8x1xf32>
    %517 = math.exp %516 : vector<8x1xf32>
    %518 = arith.subf %492, %511 : vector<8x1xf32>
    %519 = math.exp %518 : vector<8x1xf32>
    %520 = arith.subf %495, %511 : vector<8x1xf32>
    %521 = math.exp %520 : vector<8x1xf32>
    %522 = arith.subf %498, %511 : vector<8x1xf32>
    %523 = math.exp %522 : vector<8x1xf32>
    %524 = arith.subf %501, %511 : vector<8x1xf32>
    %525 = math.exp %524 : vector<8x1xf32>
    %526 = arith.subf %504, %511 : vector<8x1xf32>
    %527 = math.exp %526 : vector<8x1xf32>
    %528 = arith.addf %513, %515 : vector<8x1xf32>
    %529 = arith.addf %528, %517 : vector<8x1xf32>
    %530 = arith.addf %529, %519 : vector<8x1xf32>
    %531 = arith.addf %530, %521 : vector<8x1xf32>
    %532 = arith.addf %531, %523 : vector<8x1xf32>
    %533 = arith.addf %532, %525 : vector<8x1xf32>
    %534 = arith.addf %533, %527 : vector<8x1xf32>
    %535 = vector.broadcast %513 : vector<8x1xf32> to vector<8x32xf32>
    %536 = arith.mulf %535, %347 : vector<8x32xf32>
    %537 = vector.broadcast %515 : vector<8x1xf32> to vector<8x32xf32>
    %538 = arith.mulf %537, %366 : vector<8x32xf32>
    %539 = arith.addf %536, %538 : vector<8x32xf32>
    %540 = vector.broadcast %517 : vector<8x1xf32> to vector<8x32xf32>
    %541 = arith.mulf %540, %385 : vector<8x32xf32>
    %542 = arith.addf %539, %541 : vector<8x32xf32>
    %543 = vector.broadcast %519 : vector<8x1xf32> to vector<8x32xf32>
    %544 = arith.mulf %543, %404 : vector<8x32xf32>
    %545 = arith.addf %542, %544 : vector<8x32xf32>
    %546 = vector.broadcast %521 : vector<8x1xf32> to vector<8x32xf32>
    %547 = arith.mulf %546, %423 : vector<8x32xf32>
    %548 = arith.addf %545, %547 : vector<8x32xf32>
    %549 = vector.broadcast %523 : vector<8x1xf32> to vector<8x32xf32>
    %550 = arith.mulf %549, %442 : vector<8x32xf32>
    %551 = arith.addf %548, %550 : vector<8x32xf32>
    %552 = vector.broadcast %525 : vector<8x1xf32> to vector<8x32xf32>
    %553 = arith.mulf %552, %461 : vector<8x32xf32>
    %554 = arith.addf %551, %553 : vector<8x32xf32>
    %555 = vector.broadcast %527 : vector<8x1xf32> to vector<8x32xf32>
    %556 = arith.mulf %555, %480 : vector<8x32xf32>
    %557 = arith.addf %554, %556 : vector<8x32xf32>
    %558 = tpu.reciprocal %534 {approx = true} : vector<8x1xf32> -> vector<8x1xf32>
    %559 = arith.mulf %534, %558 : vector<8x1xf32>
    %cst_290 = arith.constant 2.000000e+00 : f32
    %560 = vector.broadcast %cst_290 : f32 to vector<8x1xf32>
    %561 = arith.subf %560, %559 : vector<8x1xf32>
    %562 = arith.mulf %558, %561 : vector<8x1xf32>
    %563 = vector.broadcast %562 : vector<8x1xf32> to vector<8x32xf32>
    %564 = arith.mulf %557, %563 : vector<8x32xf32>
    %c0_291 = arith.constant 0 : index
    %c0_292 = arith.constant 0 : index
    %565 = vector.load %arg5[%c0_291, %c0_292] : memref<32x128xf32, #tpu.memory_space<vmem>>, vector<32x128xf32>
    %cst_293 = arith.constant dense<0.000000e+00> : vector<8x128xf32>
    %566 = tpu.matmul %564, %565, %cst_293 {dimension_numbers = #tpu.dot_dimension_numbers<[1], [0], [0], [1], [0, 0, 1, 1], [], []>} : vector<8x32xf32>, vector<32x128xf32>, vector<8x128xf32> -> vector<8x128xf32>
    %c0_294 = arith.constant 0 : index
    %c0_295 = arith.constant 0 : index
    %567 = vector.load %arg6[%c0_294, %c0_295] : memref<1x128xf32, #tpu.memory_space<vmem>>, vector<1x128xf32>
    %568 = vector.broadcast %567 : vector<1x128xf32> to vector<8x128xf32>
    %569 = arith.addf %566, %568 : vector<8x128xf32>
    %c0_296 = arith.constant 0 : index
    %c0_297 = arith.constant 0 : index
    %570 = vector.load %arg7[%c0_296, %c0_297] : memref<8x128xf32, #tpu.memory_space<vmem>>, vector<8x128xf32>
    tpu.vector_store %arg7[%c0_296, %c0_297], %569 {strides = array<i32>} : memref<8x128xf32, #tpu.memory_space<vmem>>, vector<8x128xf32>,
    return
  }
}

</mosaic_0001>

<bundles_post_ra>
// kernel: model_forward.1
= control target key start
LH: loop header
LB: loop body
LE: loop exit
PB: predicated region body
PF: predicated region fallthrough
CT: control target
= control target key end

     0   :  { %12 = vsyncpa [#allocation4], 0  ;;  %s1306_s27 = smov [#allocation3]   ;;  %s1911_s0 = inlined_call_operand.vmem [shape: s32[64], index: 0, kind: input, shape index: {}]   ;;  %s1912_s1 = inlined_call_operand.vmem [shape: f32[50,1,32], index: 1, kind: input, shape index: {}]   ;;  %s1913_s2 = inlined_call_operand.vmem [shape: f32[32,128], index: 2, kind: input, shape index: {}]   ;;  %s1914_s3 = inlined_call_operand.vmem [shape: f32[32,128], index: 3, kind: input, shape index: {}]   ;;  %s1915_s4 = inlined_call_operand.vmem [shape: f32[1,128], index: 4, kind: input, shape index: {}]   ;;  %s1916_s5 = inlined_call_operand.vmem [shape: f32[32,128], index: 5, kind: input, shape index: {}]   ;;  %s1917_s6 = inlined_call_operand.vmem [shape: f32[1,128], index: 6, kind: input, shape index: {}]   ;;  %s1918_s7 = inlined_call_operand.vmem [shape: f32[8,128], index: 7, kind: output, shape index: {}]  }
   0x1   :  { %s18_s26 = sshll.u32 %s1911_s0, 4  ;;  %s19_s26 = int_to_ptr.vmem [resolvable:$true] %s18_s26 }
   0x2   :  { %21 = dma.vmem_to_smem %s19_s26, 16, %s1306_s27, [#allocation4]  }
   0x3   :  { %1304 = dma.done.wait [#allocation4], 16  }
   0x4   :  { %1305 = vsyncadd [#allocation4], 4294967280 }
   0x5   :  { %38 = sfence }
   0x6   :  { %v299_v0 = vld [vmem:[%s1913_s2 + $0x18] sm:$0xff]  ;;  %v298_v1 = vld [vmem:[%s1913_s2 + $0x10] sm:$0xff]  ;;  %s1148_s9 = sld [smem:[#allocation3 + $0x5]]  ;;  %v297_v3 = vld [vmem:[%s1913_s2 + $0x8] sm:$0xff]  ;;  %vm42_vm0 = vcmask 253952   ;;  %vm316_vm1 = vcmask 261120  }
   0x7   :  { %1196 = vmatpush.msra.mxu1 %v299_v0  ;;  %353 = vmatpush.msra.mxu0 %v299_v0  ;;  %s1359_s10 = sld [smem:[#allocation3 + $0xd]]  ;;  %v1364_v2 = vld [vmem:[%s1914_s3 + $0x18] sm:$0xff]  ;;  %v1377_v4 = vld [vmem:[%s1914_s3 + $0x10] sm:$0xff]  ;;  %v296_v5 = vld [vmem:[%s1913_s2] sm:$0xff]  ;;  %v1307_v26 = vmov 0.0  }
   0x8   :  { %s1369_s14 = sld [smem:[#allocation3 + $0x15]]  ;;  %1197 = vmatpush.msra.mxu2 %v299_v0  ;;  %523 = vmatpush.msra.mxu3 %v1364_v2  ;;  %v1390_v6 = vld [vmem:[%s1914_s3 + $0x8] sm:$0xff]  ;;  %v1407_v8 = vld [vmem:[%s1914_s3] sm:$0xff] }
   0x9   :  { %1198 = vmatpush.msra.mxu1 %v298_v1  ;;  %s1372_s15 = sld [smem:[#allocation3 + $0x1d]]  ;;  %354 = vmatpush.msra.mxu0 %v298_v1  ;;  %v1516_v28 = vld [vmem:[%s1915_s4] ss:$0 sm:$0xff] }
   0xa   :  { %s1382_s20 = sld [smem:[#allocation3 + $0x25]]  ;;  %1199 = vmatpush.msra.mxu2 %v298_v1  ;;  %524 = vmatpush.msra.mxu3 %v1377_v4 }
   0xb   :  { %1200 = vmatpush.msra.mxu1 %v297_v3  ;;  %s1385_s21 = sld [smem:[#allocation3 + $0x2d]]  ;;  %355 = vmatpush.msra.mxu0 %v297_v3 }
   0xc   :  { %s201_s2 = scalar_lea.vmem %s1912_s1, %s1148_s9  ;;  %s1395_s26 = sld [smem:[#allocation3 + $0x35]]  ;;  %1201 = vmatpush.msra.mxu2 %v297_v3  ;;  %525 = vmatpush.msra.mxu3 %v1390_v6 }
   0xd   :  { %1202 = vmatpush.msra.mxu1 %v296_v5  ;;  %v202_v7 = vld [vmem:[%s201_s2] sm:$0x1]  ;;  %s205_s29 = scalar_lea.vmem %s1912_s1, %s1359_s10  ;;  %s1402_s30 = sld [smem:[#allocation3 + $0x3d]]  ;;  %356 = vmatpush.msra.mxu0 %v296_v5 }
   0xe   :  { %203 = vst.msk [vmem:[#allocation2 + $0x28] sm:$0x1] %vm42_vm0, %v202_v7  ;;  %v206_v9 = vld [vmem:[%s205_s29] sm:$0x1]  ;;  %s209_s12 = scalar_lea.vmem %s1912_s1, %s1369_s14  ;;  %s1415_s13 = sld [smem:[#allocation3]]  ;;  %1203 = vmatpush.msra.mxu2 %v296_v5  ;;  %526 = vmatpush.msra.mxu3 %v1407_v8 }
   0xf   :  { %397 = vmatpush.msrb.mxu1 %v1364_v2  ;;  %207 = vst.msk [vmem:[#allocation2 + $0x29] sm:$0x1] %vm42_vm0, %v206_v9  ;;  %v210_v10 = vld [vmem:[%s209_s12] sm:$0x1]  ;;  %s213_s3 = scalar_lea.vmem %s1912_s1, %s1372_s15  ;;  %s1422_s17 = sld [smem:[#allocation3 + $0x8]] }
  0x10   :  { %460 = vmatpush.msrb.mxu2 %v1364_v2  ;;  %211 = vst.msk [vmem:[#allocation2 + $0x2a] sm:$0x1] %vm42_vm0, %v210_v10  ;;  %v214_v11 = vld [vmem:[%s213_s3] sm:$0x1]  ;;  %s217_s19 = scalar_lea.vmem %s1912_s1, %s1382_s20  ;;  %s1432_s22 = sld [smem:[#allocation3 + $0x10]]  ;;  %712 = vmatpush.msrb.mxu3 %v1364_v2 }
  0x11   :  { %398 = vmatpush.msrb.mxu1 %v1377_v4  ;;  %215 = vst.msk [vmem:[#allocation2 + $0x2b] sm:$0x1] %vm42_vm0, %v214_v11  ;;  %v218_v12 = vld [vmem:[%s217_s19] sm:$0x1]  ;;  %s221_s24 = scalar_lea.vmem %s1912_s1, %s1385_s21  ;;  %s1440_s25 = sld [smem:[#allocation3 + $0x18]] }
  0x12   :  { %461 = vmatpush.msrb.mxu2 %v1377_v4  ;;  %219 = vst.msk [vmem:[#allocation2 + $0x2c] sm:$0x1] %vm42_vm0, %v218_v12  ;;  %v222_v13 = vld [vmem:[%s221_s24] sm:$0x1]  ;;  %s225_s27 = scalar_lea.vmem %s1912_s1, %s1395_s26  ;;  %s1449_s28 = sld [smem:[#allocation3 + $0x20]]  ;;  %713 = vmatpush.msrb.mxu3 %v1377_v4 }
  0x13   :  { %399 = vmatpush.msrb.mxu1 %v1390_v6  ;;  %223 = vst.msk [vmem:[#allocation2 + $0x2d] sm:$0x1] %vm42_vm0, %v222_v13  ;;  %v226_v14 = vld [vmem:[%s225_s27] sm:$0x1]  ;;  %s229_s8 = scalar_lea.vmem %s1912_s1, %s1402_s30  ;;  %s1113_s0 = sld [smem:[#allocation3 + $0x28]] }
  0x14   :  { %462 = vmatpush.msrb.mxu2 %v1390_v6  ;;  %227 = vst.msk [vmem:[#allocation2 + $0x2e] sm:$0x1] %vm42_vm0, %v226_v14  ;;  %v230_v15 = vld [vmem:[%s229_s8] sm:$0x1]  ;;  %s40_s11 = scalar_lea.vmem %s1912_s1, %s1415_s13  ;;  %s1114_s12 = sld [smem:[#allocation3 + $0x30]]  ;;  %714 = vmatpush.msrb.mxu3 %v1390_v6 }
  0x15   :  { %400 = vmatpush.msrb.mxu1 %v1407_v8  ;;  %231 = vst.msk [vmem:[#allocation2 + $0x2f] sm:$0x1] %vm42_vm0, %v230_v15  ;;  %v41_v16 = vld [vmem:[%s40_s11] sm:$0x1]  ;;  %s45_s16 = scalar_lea.vmem %s1912_s1, %s1422_s17  ;;  %s1115_s3 = sld [smem:[#allocation3 + $0x38]] }
  0x16   :  { %463 = vmatpush.msrb.mxu2 %v1407_v8  ;;  %43 = vst.msk [vmem:[#allocation2] sm:$0x1] %vm42_vm0, %v41_v16  ;;  %v46_v17 = vld [vmem:[%s45_s16] sm:$0x1]  ;;  %s49_s18 = scalar_lea.vmem %s1912_s1, %s1432_s22  ;;  %715 = vmatpush.msrb.mxu3 %v1407_v8  ;;  %s1308_s11 = smov 32  }
  0x17   :  { %47 = vst.msk [vmem:[#allocation2 + $0x1] sm:$0x1] %vm42_vm0, %v46_v17  ;;  %v50_v18 = vld [vmem:[%s49_s18] sm:$0x1]  ;;  %s53_s23 = scalar_lea.vmem %s1912_s1, %s1440_s25  ;;  %s1156_s4 = sld [smem:[#allocation3 + $0x6]] }
  0x18   :  { %51 = vst.msk [vmem:[#allocation2 + $0x2] sm:$0x1] %vm42_vm0, %v50_v18  ;;  %v54_v19 = vld [vmem:[%s53_s23] sm:$0x1]  ;;  %s57_s20 = scalar_lea.vmem %s1912_s1, %s1449_s28  ;;  %s1158_s30 = sld [smem:[#allocation3 + $0x16]] }
  0x19   :  { %55 = vst.msk [vmem:[#allocation2 + $0x3] sm:$0x1] %vm42_vm0, %v54_v19  ;;  %v58_v20 = vld [vmem:[%s57_s20] sm:$0x1]  ;;  %s61_s27 = scalar_lea.vmem %s1912_s1, %s1113_s0  ;;  %s1159_s10 = sld [smem:[#allocation3 + $0x1e]] }
  0x1a   :  { %59 = vst.msk [vmem:[#allocation2 + $0x4] sm:$0x1] %vm42_vm0, %v58_v20  ;;  %v62_v21 = vld [vmem:[%s61_s27] sm:$0x1]  ;;  %s65_s29 = scalar_lea.vmem %s1912_s1, %s1114_s12  ;;  %s1157_s12 = sld [smem:[#allocation3 + $0xe]] }
  0x1b   :  { %63 = vst.msk [vmem:[#allocation2 + $0x5] sm:$0x1] %vm42_vm0, %v62_v21  ;;  %v66_v22 = vld [vmem:[%s65_s29] sm:$0x1]  ;;  %s69_s26 = scalar_lea.vmem %s1912_s1, %s1115_s3  ;;  %s1160_s16 = sld [smem:[#allocation3 + $0x26]] }
  0x1c   :  { %v310_v23 = vld [vmem:[#allocation2 + $0x28] sm:$0xff]  ;;  %67 = vst.msk [vmem:[#allocation2 + $0x6] sm:$0x1] %vm42_vm0, %v66_v22  ;;  %v70_v24 = vld [vmem:[%s69_s26] sm:$0x1]  ;;  %s1161_s3 = sld [smem:[#allocation3 + $0x2e]] }
  0x1d   :  { %1177 = vmatmul.msk.f32.vlgmr.msra.gmra.mxu1 %vm316_vm1, %v310_v23  ;;  %71 = vst.msk [vmem:[#allocation2 + $0x7] sm:$0x1] %vm42_vm0, %v70_v24  ;;  %s1529_s13 = sld [smem:[#allocation3 + $0x36]]  ;;  %s233_s23 = scalar_lea.vmem %s1912_s1, %s1156_s4 }
  0x1e   :  { %586 = vmatpush.msra.mxu1 %v1364_v2  ;;  %s1531_s14 = sld [smem:[#allocation3 + $0x3e]]  ;;  %s241_s25 = scalar_lea.vmem %s1912_s1, %s1158_s30  ;;  %v234_v53 = vld [vmem:[%s233_s23] sm:$0x1] }
  0x1f   :  { %s1533_s18 = sld [smem:[#allocation3 + $0x7]]  ;;  %s245_s26 = scalar_lea.vmem %s1912_s1, %s1159_s10  ;;  %v242_v55 = vld [vmem:[%s241_s25] sm:$0x1]  ;;  %235 = vst.msk [vmem:[#allocation2 + $0x30] sm:$0x1] %vm42_vm0, %v234_v53 }
  0x20   :  { %587 = vmatpush.msra.mxu1 %v1377_v4  ;;  %s1538_s17 = sld [smem:[#allocation3 + $0xf]]  ;;  %s237_s22 = scalar_lea.vmem %s1912_s1, %s1157_s12  ;;  %v246_v56 = vld [vmem:[%s245_s26] sm:$0x1]  ;;  %243 = vst.msk [vmem:[#allocation2 + $0x32] sm:$0x1] %vm42_vm0, %v242_v55 }
  0x21   :  { %s1543_s2 = sld [smem:[#allocation3 + $0x17]]  ;;  %s249_s19 = scalar_lea.vmem %s1912_s1, %s1160_s16  ;;  %v238_v54 = vld [vmem:[%s237_s22] sm:$0x1]  ;;  %247 = vst.msk [vmem:[#allocation2 + $0x33] sm:$0x1] %vm42_vm0, %v246_v56 }
  0x22   :  { %588 = vmatpush.msra.mxu1 %v1390_v6  ;;  %s1548_s29 = sld [smem:[#allocation3 + $0x1f]]  ;;  %s253_s24 = scalar_lea.vmem %s1912_s1, %s1161_s3  ;;  %239 = vst.msk [vmem:[#allocation2 + $0x31] sm:$0x1] %vm42_vm0, %v238_v54  ;;  %v250_v57 = vld [vmem:[%s249_s19] sm:$0x1] }
  0x23   :  { %s1553_s0 = sld [smem:[#allocation3 + $0x27]]  ;;  %s257_s27 = scalar_lea.vmem %s1912_s1, %s1529_s13  ;;  %v254_v58 = vld [vmem:[%s253_s24] sm:$0x1]  ;;  %251 = vst.msk [vmem:[#allocation2 + $0x34] sm:$0x1] %vm42_vm0, %v250_v57 }
  0x24   :  { %v305_v25 = vld [vmem:[#allocation2] sm:$0xff]  ;;  %589 = vmatpush.msra.mxu1 %v1407_v8  ;;  %s1558_s12 = sld [smem:[#allocation3 + $0x2f]]  ;;  %s261_s21 = scalar_lea.vmem %s1912_s1, %s1531_s14  ;;  %255 = vst.msk [vmem:[#allocation2 + $0x35] sm:$0x1] %vm42_vm0, %v254_v58 }
  0x25   :  { %1172 = vmatmul.msk.f32.vlgmr.msra.gmra.mxu0 %vm316_vm1, %v305_v25  ;;  %401 = vmatmul.f32.vlgmr.msrb.gmra.mxu1 %v1307_v26  ;;  %s1568_s16 = sld [smem:[#allocation3 + $0x37]]  ;;  %s265_s13 = scalar_lea.vmem %s1912_s1, %s1533_s18  ;;  %v258_v59 = vld [vmem:[%s257_s27] sm:$0x1] }
  0x26   :  { %775 = vmatpush.msrb.mxu1 %v1364_v2  ;;  %s1575_s3 = sld [smem:[#allocation3 + $0x3f]]  ;;  %s269_s9 = scalar_lea.vmem %s1912_s1, %s1538_s17  ;;  %v262_v60 = vld [vmem:[%s261_s21] sm:$0x1]  ;;  %259 = vst.msk [vmem:[#allocation2 + $0x36] sm:$0x1] %vm42_vm0, %v258_v59 }
  0x27   :  { %s273_s19 = scalar_lea.vmem %s1912_s1, %s1543_s2  ;;  %v266_v61 = vld [vmem:[%s265_s13] sm:$0x1]  ;;  %263 = vst.msk [vmem:[#allocation2 + $0x37] sm:$0x1] %vm42_vm0, %v262_v60  ;;  %s1118_s8 = sld [smem:[#allocation3 + $0x11]] }
  0x28   :  { %776 = vmatpush.msrb.mxu1 %v1377_v4  ;;  %s277_s15 = scalar_lea.vmem %s1912_s1, %s1548_s29  ;;  %v270_v62 = vld [vmem:[%s269_s9] sm:$0x1]  ;;  %267 = vst.msk [vmem:[#allocation2 + $0x38] sm:$0x1] %vm42_vm0, %v266_v61  ;;  %s1119_s13 = sld [smem:[#allocation3 + $0x19]] }
  0x29   :  { %s281_s10 = scalar_lea.vmem %s1912_s1, %s1553_s0  ;;  %v274_v63 = vld [vmem:[%s273_s19] sm:$0x1]  ;;  %271 = vst.msk [vmem:[#allocation2 + $0x39] sm:$0x1] %vm42_vm0, %v270_v62  ;;  %s1120_s28 = sld [smem:[#allocation3 + $0x21]] }
  0x2a   :  { %777 = vmatpush.msrb.mxu1 %v1390_v6  ;;  %s285_s2 = scalar_lea.vmem %s1912_s1, %s1558_s12  ;;  %v278_v0 = vld [vmem:[%s277_s15] sm:$0x1]  ;;  %275 = vst.msk [vmem:[#allocation2 + $0x3a] sm:$0x1] %vm42_vm0, %v274_v63  ;;  %s1309_s12 = smov 64  }
  0x2b   :  { %s289_s29 = scalar_lea.vmem %s1912_s1, %s1568_s16  ;;  %v282_v1 = vld [vmem:[%s281_s10] sm:$0x1]  ;;  %279 = vst.msk [vmem:[#allocation2 + $0x3b] sm:$0x1] %vm42_vm0, %v278_v0  ;;  %s1116_s16 = sld [smem:[#allocation3 + $0x1]] }
  0x2c   :  { %778 = vmatpush.msrb.mxu1 %v1407_v8  ;;  %s293_s0 = scalar_lea.vmem %s1912_s1, %s1575_s3  ;;  %v286_v3 = vld [vmem:[%s285_s2] sm:$0x1]  ;;  %283 = vst.msk [vmem:[#allocation2 + $0x3c] sm:$0x1] %vm42_vm0, %v282_v1  ;;  %s1117_s3 = sld [smem:[#allocation3 + $0x9]] }
  0x2d   :  { %v290_v5 = vld [vmem:[%s289_s29] sm:$0x1]  ;;  %287 = vst.msk [vmem:[#allocation2 + $0x3d] sm:$0x1] %vm42_vm0, %v286_v3  ;;  %s1121_s26 = sld [smem:[#allocation3 + $0x29]]  ;;  %s81_s20 = scalar_lea.vmem %s1912_s1, %s1118_s8 }
  0x2e   :  { %v294_v7 = vld [vmem:[%s293_s0] sm:$0x1]  ;;  %v311_v9 = vld [vmem:[#allocation2 + $0x30] sm:$0xff]  ;;  %291 = vst.msk [vmem:[#allocation2 + $0x3e] sm:$0x1] %vm42_vm0, %v290_v5  ;;  %s1122_s9 = sld [smem:[#allocation3 + $0x31]]  ;;  %s85_s23 = scalar_lea.vmem %s1912_s1, %s1119_s13 }
  0x2f   :  { %1178 = vmatmul.msk.f32.vlgmr.msra.gmra.mxu2 %vm316_vm1, %v311_v9  ;;  %295 = vst.msk [vmem:[#allocation2 + $0x3f] sm:$0x1] %vm42_vm0, %v294_v7  ;;  %s1123_s14 = sld [smem:[#allocation3 + $0x39]]  ;;  %s89_s21 = scalar_lea.vmem %s1912_s1, %s1120_s28  ;;  %v82_v15 = vld [vmem:[%s81_s20] sm:$0x1] }
  0x30   :  { %649 = vmatpush.msra.mxu2 %v1364_v2  ;;  %v86_v16 = vld [vmem:[%s85_s23] sm:$0x1]  ;;  %83 = vst.msk [vmem:[#allocation2 + $0xa] sm:$0x1] %vm42_vm0, %v82_v15  ;;  %s1128_s30 = sld [smem:[#allocation3 + $0x22]] }
  0x31   :  { %s73_s18 = scalar_lea.vmem %s1912_s1, %s1116_s16  ;;  %v90_v17 = vld [vmem:[%s89_s21] sm:$0x1]  ;;  %87 = vst.msk [vmem:[#allocation2 + $0xb] sm:$0x1] %vm42_vm0, %v86_v16  ;;  %s1129_s15 = sld [smem:[#allocation3 + $0x2a]] }
  0x32   :  { %650 = vmatpush.msra.mxu2 %v1377_v4  ;;  %s77_s24 = scalar_lea.vmem %s1912_s1, %s1117_s3  ;;  %v74_v13 = vld [vmem:[%s73_s18] sm:$0x1]  ;;  %91 = vst.msk [vmem:[#allocation2 + $0xc] sm:$0x1] %vm42_vm0, %v90_v17  ;;  %s1127_s18 = sld [smem:[#allocation3 + $0x1a]] }
  0x33   :  { %v78_v14 = vld [vmem:[%s77_s24] sm:$0x1]  ;;  %s93_s16 = scalar_lea.vmem %s1912_s1, %s1121_s26  ;;  %75 = vst.msk [vmem:[#allocation2 + $0x8] sm:$0x1] %vm42_vm0, %v74_v13  ;;  %s1124_s26 = sld [smem:[#allocation3 + $0x2]] }
  0x34   :  { %651 = vmatpush.msra.mxu2 %v1390_v6  ;;  %s97_s4 = scalar_lea.vmem %s1912_s1, %s1122_s9  ;;  %79 = vst.msk [vmem:[#allocation2 + $0x9] sm:$0x1] %vm42_vm0, %v78_v14  ;;  %v94_v18 = vld [vmem:[%s93_s16] sm:$0x1]  ;;  %s1125_s9 = sld [smem:[#allocation3 + $0xa]] }
  0x35   :  { %s101_s28 = scalar_lea.vmem %s1912_s1, %s1123_s14  ;;  %v98_v19 = vld [vmem:[%s97_s4] sm:$0x1]  ;;  %95 = vst.msk [vmem:[#allocation2 + $0xd] sm:$0x1] %vm42_vm0, %v94_v18  ;;  %s1126_s14 = sld [smem:[#allocation3 + $0x12]] }
  0x36   :  { %v312_v10 = vld [vmem:[#allocation2 + $0x38] sm:$0xff]  ;;  %652 = vmatpush.msra.mxu2 %v1407_v8  ;;  %v102_v20 = vld [vmem:[%s101_s28] sm:$0x1]  ;;  %99 = vst.msk [vmem:[#allocation2 + $0xe] sm:$0x1] %vm42_vm0, %v98_v19  ;;  %s1130_s24 = sld [smem:[#allocation3 + $0x32]]  ;;  %s121_s13 = scalar_lea.vmem %s1912_s1, %s1128_s30 }
  0x37   :  { %1179 = vmatmul.msk.f32.gmra.mxu2 %vm316_vm1, %v312_v10  ;;  %103 = vst.msk [vmem:[#allocation2 + $0xf] sm:$0x1] %vm42_vm0, %v102_v20  ;;  %s1131_s17 = sld [smem:[#allocation3 + $0x3a]]  ;;  %v122_v53 = vld [vmem:[%s121_s13] sm:$0x1] }
  0x38   :  { %s117_s3 = scalar_lea.vmem %s1912_s1, %s1127_s18  ;;  %123 = vst.msk [vmem:[#allocation2 + $0x14] sm:$0x1] %vm42_vm0, %v122_v53  ;;  %s1136_s2 = sld [smem:[#allocation3 + $0x23]] }
  0x39   :  { %s105_s27 = scalar_lea.vmem %s1912_s1, %s1124_s26  ;;  %s125_s26 = scalar_lea.vmem %s1912_s1, %s1129_s15 }
  0x3a   :  { %s109_s22 = scalar_lea.vmem %s1912_s1, %s1125_s9  ;;  %v126_v54 = vld [vmem:[%s125_s26] sm:$0x1]  ;;  %s1132_s15 = sld [smem:[#allocation3 + $0x3]] }
  0x3b   :  { %s113_s25 = scalar_lea.vmem %s1912_s1, %s1126_s14  ;;  %127 = vst.msk [vmem:[#allocation2 + $0x15] sm:$0x1] %vm42_vm0, %v126_v54  ;;  %s1137_s23 = sld [smem:[#allocation3 + $0x2b]] }
  0x3c   :  { %s129_s10 = scalar_lea.vmem %s1912_s1, %s1130_s24  ;;  %s1133_s24 = sld [smem:[#allocation3 + $0xb]] }
  0x3d   :  { %s133_s30 = scalar_lea.vmem %s1912_s1, %s1131_s17  ;;  %v130_v55 = vld [vmem:[%s129_s10] sm:$0x1]  ;;  %s1134_s17 = sld [smem:[#allocation3 + $0x13]] }
  0x3e   :  { %v306_v21 = vld [vmem:[#allocation2 + $0x8] sm:$0xff]  ;;  %v134_v56 = vld [vmem:[%s133_s30] sm:$0x1]  ;;  %131 = vst.msk [vmem:[#allocation2 + $0x16] sm:$0x1] %vm42_vm0, %v130_v55  ;;  %s1139_s29 = sld [smem:[#allocation3 + $0x3b]]  ;;  %s153_s18 = scalar_lea.vmem %s1912_s1, %s1136_s2 }
  0x3f   :  { %1173 = vmatmul.msk.f32.gmra.mxu0 %vm316_vm1, %v306_v21  ;;  %135 = vst.msk [vmem:[#allocation2 + $0x17] sm:$0x1] %vm42_vm0, %v134_v56  ;;  %s1144_s16 = sld [smem:[#allocation3 + $0x24]] }
  0x40   :  { %s137_s0 = scalar_lea.vmem %s1912_s1, %s1132_s15  ;;  %s1147_s4 = sld [smem:[#allocation3 + $0x3c]] }
  0x41   :  { %s157_s15 = scalar_lea.vmem %s1912_s1, %s1137_s23  ;;  %s1140_s23 = sld [smem:[#allocation3 + $0x4]] }
  0x42   :  { %s141_s8 = scalar_lea.vmem %s1912_s1, %s1133_s24 }
  0x43   :  { %s145_s19 = scalar_lea.vmem %s1912_s1, %s1134_s17 }
  0x44   :  { %s165_s2 = scalar_lea.vmem %s1912_s1, %s1139_s29  ;;  %s1142_s29 = sld [smem:[#allocation3 + $0x14]] }
  0x47   :  { %s169_s28 = scalar_lea.vmem %s1912_s1, %s1140_s23 }
  0x4a   :  { %s177_s20 = scalar_lea.vmem %s1912_s1, %s1142_s29 }
  0x9a   :  { %v1511_v27 = vpop.f32.mrf.mxu1 }
  0xa2   :  { %v358_v29 = vpop.f32.mrf.mxu0  ;;  %v402_v30 = vpop.f32.mrf.mxu1 }
  0xa3   :  { %v359_v31 = vadd.f32 %v1516_v28, %v358_v29 }
  0xa5   :  { %v405_v32 = vadd.f32 %v402_v30, %v359_v31 }
  0xa7   :  { %1210 = vtanh.f32 %v405_v32  ;;  %v1180_v34 = vmul.f32 -1.442695, %v405_v32 }
  0xa9   :  { %1212 = vpow2.f32 %v1180_v34 }
  0xad   :  { %v1211_v33 = vpop.eup %1210 }
  0xae   :  { %428 = vrot.lane.b32.xlu0 %v1211_v33, %s1308_s11 }
  0xaf   :  { %v1213_v35 = vpop.eup %1212 }
  0xb0   :  { %v409_v36 = vadd.f32 1.0, %v1213_v35 }
  0xb2   :  { %1214 = vrcp.f32 %v409_v36  ;;  %v421_v42 = vand.u32 2147483648, %v409_v36  ;;  %vm415_vm3 = vweird.f32 %v409_v36  ;;  %v419_v43 = vand.u32 2147483647, %v409_v36  ;;  %v1672_v23 = vpop.f32.mrf.mxu2 }
  0xb4   :  { %v422_v45 = vor.u32 1.1754944e-38, %v421_v42  ;;  %vm420_vm5 = vcmp.eq.f32.partialorder %v419_v43, 8.507059e+37 }
  0xb8   :  { %v1215_v37 = vpop.eup %1214 }
  0xb9   :  { %v411_v38 = vmul.f32 %v1215_v37, %v409_v36  ;;  %vm416_vm2 = vweird.f32 %v1215_v37 }
  0xba   :  { %vm417_vm4 = vmor %vm415_vm3, %vm416_vm2  ;;  %v1674_v24 = vpop.f32.mrf.mxu2 }
  0xbb   :  { %v412_v39 = vsub.f32 1.0, %v411_v38 }
  0xbc   :  { %v361_v25 = vpop.f32.mrf.mxu0 }
  0xbd   :  { %v413_v40 = vmul.f32 %v1215_v37, %v412_v39  ;;  %v362_v26 = vadd.f32 %v1516_v28, %v361_v25 }
  0xbf   :  { %v414_v41 = vadd.f32 %v1215_v37, %v413_v40 }
  0xc1   :  { %v418_v44 = vsel %vm417_vm4, %v1215_v37, %v414_v41 }
  0xc2   :  { %v1520_v47 = vsel %vm420_vm5, %v422_v45, %v418_v44 }
  0xc3   :  { %v426_v49 = vmul.f32 0.0, %v1520_v47 }
 0x120   :  { %v429_v46 = vpop.permute.xlu0 %428 }
 0x121   :  { %v431_v48 = vmul.f32 %v429_v46, %v1520_v47 }
 0x123   :  { %433 = vrot.lane.b32.xlu0 %v431_v48, %s1308_s11 }
 0x195   :  { %v434_v50 = vpop.permute.xlu0 %433 }
 0x196   :  { %v1525_v51 = vadd.f32 %v434_v50, %v426_v49  ;;  %v106_v49 = vld [vmem:[%s105_s27] sm:$0x1]  ;;  %s1135_s27 = sld [smem:[#allocation3 + $0x1b]] }
 0x197   :  { %v110_v50 = vld [vmem:[%s109_s22] sm:$0x1]  ;;  %107 = vst.msk [vmem:[#allocation2 + $0x10] sm:$0x1] %vm42_vm0, %v106_v49  ;;  %s1138_s22 = sld [smem:[#allocation3 + $0x33]] }
 0x198   :  { %1216 = vtanh.f32 %v1525_v51  ;;  %111 = vst.msk [vmem:[#allocation2 + $0x11] sm:$0x1] %vm42_vm0, %v110_v50 }
 0x19c   :  { %s149_s9 = scalar_lea.vmem %s1912_s1, %s1135_s27  ;;  %s185_s27 = scalar_lea.vmem %s1912_s1, %s1144_s16 }
 0x19d   :  { %s161_s21 = scalar_lea.vmem %s1912_s1, %s1138_s22  ;;  %s1141_s22 = sld [smem:[#allocation3 + $0xc]] }
 0x19e   :  { %v1217_v52 = vpop.eup %1216  ;;  %s197_s16 = scalar_lea.vmem %s1912_s1, %s1147_s4 }
 0x19f   :  { %439 = vrot.lane.b32.xlu1 %v1217_v52, %s1308_s11  ;;  %v118_v52 = vld [vmem:[%s117_s3] sm:$0x1]  ;;  %s1145_s3 = sld [smem:[#allocation3 + $0x2c]] }
 0x1a0   :  { %119 = vst.msk [vmem:[#allocation2 + $0x13] sm:$0x1] %vm42_vm0, %v118_v52 }
 0x1a3   :  { %s173_s14 = scalar_lea.vmem %s1912_s1, %s1141_s22 }
 0x1a5   :  { %s189_s23 = scalar_lea.vmem %s1912_s1, %s1145_s3 }
 0x211   :  { %v440_v11 = vpop.permute.xlu1 %439 }
 0x212   :  { %v1630_v12 = vmul.f32 %v440_v11, %v1520_v47 }
 0x214   :  { %444 = vrot.lane.b32.xlu1 %v1630_v12, %s1309_s12 }
 0x286   :  { %v445_v22 = vpop.permute.xlu1 %444 }
 0x287   :  { %1181 = vmatmul.msk.f32.vlgmr.msrb.gmra.mxu2 %vm316_vm1, %v445_v22 }
 0x288   :  { %838 = vmatpush.msrb.mxu2 %v1364_v2 }
 0x28a   :  { %839 = vmatpush.msrb.mxu2 %v1377_v4 }
 0x28c   :  { %840 = vmatpush.msrb.mxu2 %v1390_v6 }
 0x28e   :  { %841 = vmatpush.msrb.mxu2 %v1407_v8 }
 0x30a   :  { %v465_v29 = vpop.f32.mrf.mxu2 }
 0x30b   :  { %v468_v30 = vadd.f32 %v465_v29, %v362_v26  ;;  %v138_v26 = vld [vmem:[%s137_s0] sm:$0x1]  ;;  %s1143_s0 = sld [smem:[#allocation3 + $0x1c]] }
 0x30c   :  { %v142_v29 = vld [vmem:[%s141_s8] sm:$0x1]  ;;  %139 = vst.msk [vmem:[#allocation2 + $0x18] sm:$0x1] %vm42_vm0, %v138_v26  ;;  %s1146_s8 = sld [smem:[#allocation3 + $0x34]] }
 0x30d   :  { %1218 = vtanh.f32 %v468_v30  ;;  %v1182_v2 = vmul.f32 -1.442695, %v468_v30  ;;  %v146_v30 = vld [vmem:[%s145_s19] sm:$0x1]  ;;  %143 = vst.msk [vmem:[#allocation2 + $0x19] sm:$0x1] %vm42_vm0, %v142_v29 }
 0x30e   :  { %147 = vst.msk [vmem:[#allocation2 + $0x1a] sm:$0x1] %vm42_vm0, %v146_v30 }
 0x30f   :  { %1220 = vpow2.f32 %v1182_v2  ;;  %v154_v2 = vld [vmem:[%s153_s18] sm:$0x1] }
 0x310   :  { %155 = vst.msk [vmem:[#allocation2 + $0x1c] sm:$0x1] %vm42_vm0, %v154_v2 }
 0x311   :  { %s181_s24 = scalar_lea.vmem %s1912_s1, %s1143_s0 }
 0x312   :  { %s193_s13 = scalar_lea.vmem %s1912_s1, %s1146_s8 }
 0x313   :  { %v1219_v31 = vpop.eup %1218 }
 0x314   :  { %491 = vrot.lane.b32.xlu2 %v1219_v31, %s1308_s11  ;;  %v150_v31 = vld [vmem:[%s149_s9] sm:$0x1] }
 0x315   :  { %v1221_v4 = vpop.eup %1220  ;;  %151 = vst.msk [vmem:[#allocation2 + $0x1b] sm:$0x1] %vm42_vm0, %v150_v31 }
 0x316   :  { %v472_v32 = vadd.f32 1.0, %v1221_v4  ;;  %v158_v4 = vld [vmem:[%s157_s15] sm:$0x1] }
 0x317   :  { %159 = vst.msk [vmem:[#allocation2 + $0x1d] sm:$0x1] %vm42_vm0, %v158_v4 }
 0x318   :  { %1222 = vrcp.f32 %v472_v32  ;;  %v484_v36 = vand.u32 2147483648, %v472_v32  ;;  %vm478_vm7 = vweird.f32 %v472_v32  ;;  %v482_v37 = vand.u32 2147483647, %v472_v32 }
 0x31a   :  { %v485_v39 = vor.u32 1.1754944e-38, %v484_v36  ;;  %vm483_vm9 = vcmp.eq.f32.partialorder %v482_v37, 8.507059e+37 }
 0x31e   :  { %v1223_v6 = vpop.eup %1222 }
 0x31f   :  { %v474_v8 = vmul.f32 %v1223_v6, %v472_v32  ;;  %vm479_vm6 = vweird.f32 %v1223_v6  ;;  %v162_v32 = vld [vmem:[%s161_s21] sm:$0x1] }
 0x320   :  { %vm480_vm8 = vmor %vm478_vm7, %vm479_vm6  ;;  %163 = vst.msk [vmem:[#allocation2 + $0x1e] sm:$0x1] %vm42_vm0, %v162_v32 }
 0x321   :  { %v475_v33 = vsub.f32 1.0, %v474_v8 }
 0x323   :  { %v476_v34 = vmul.f32 %v1223_v6, %v475_v33 }
 0x325   :  { %v477_v35 = vadd.f32 %v1223_v6, %v476_v34 }
 0x327   :  { %v481_v38 = vsel %vm480_vm8, %v1223_v6, %v477_v35  ;;  %v166_v6 = vld [vmem:[%s165_s2] sm:$0x1] }
 0x328   :  { %v486_v41 = vsel %vm483_vm9, %v485_v39, %v481_v38  ;;  %167 = vst.msk [vmem:[#allocation2 + $0x1f] sm:$0x1] %vm42_vm0, %v166_v6 }
 0x329   :  { %v489_v43 = vmul.f32 %v486_v41, %v1525_v51  ;;  %v114_v51 = vld [vmem:[%s113_s25] sm:$0x1] }
 0x32a   :  { %115 = vst.msk [vmem:[#allocation2 + $0x12] sm:$0x1] %vm42_vm0, %v114_v51 }
 0x32f   :  { %v308_v8 = vld [vmem:[#allocation2 + $0x18] sm:$0xff] }
 0x331   :  { %v307_v57 = vld [vmem:[#allocation2 + $0x10] sm:$0xff] }
 0x332   :  { %1174 = vmatmul.msk.f32.gmra.mxu0 %vm316_vm1, %v307_v57 }
 0x33a   :  { %1175 = vmatmul.msk.f32.gmra.mxu0 %vm316_vm1, %v308_v8 }
 0x36e   :  { %v492_v40 = vpop.permute.xlu2 %491 }
 0x36f   :  { %v494_v42 = vmul.f32 %v492_v40, %v486_v41 }
 0x371   :  { %496 = vrot.lane.b32.xlu2 %v494_v42, %s1308_s11 }
 0x3af   :  { %v364_v59 = vpop.f32.mrf.mxu0 }
 0x3b0   :  { %v365_v60 = vadd.f32 %v1516_v28, %v364_v59 }
 0x3b7   :  { %v367_v36 = vpop.f32.mrf.mxu0 }
 0x3b8   :  { %v368_v37 = vadd.f32 %v1516_v28, %v367_v36 }
 0x3cb   :  { %v497_v44 = vpop.permute.xlu2 %496 }
 0x3cc   :  { %v1680_v45 = vadd.f32 %v497_v44, %v489_v43 }
 0x3ce   :  { %1224 = vtanh.f32 %v1680_v45 }
 0x3d4   :  { %v1225_v46 = vpop.eup %1224 }
 0x3d5   :  { %502 = vrot.lane.b32.xlu0 %v1225_v46, %s1308_s11 }
 0x447   :  { %v503_v47 = vpop.permute.xlu0 %502 }
 0x448   :  { %v1684_v48 = vmul.f32 %v503_v47, %v486_v41 }
 0x44a   :  { %507 = vrot.lane.b32.xlu1 %v1684_v48, %s1309_s12 }
 0x4bc   :  { %v508_v58 = vpop.permute.xlu1 %507 }
 0x4bd   :  { %1183 = vmatmul.msk.f32.vlgmr.msra.gmra.mxu3 %vm316_vm1, %v508_v58 }
 0x540   :  { %v528_v61 = vpop.f32.mrf.mxu3 }
 0x541   :  { %v531_v62 = vadd.f32 %v528_v61, %v365_v60 }
 0x543   :  { %1226 = vtanh.f32 %v531_v62  ;;  %v1184_v0 = vmul.f32 -1.442695, %v531_v62 }
 0x545   :  { %1228 = vpow2.f32 %v1184_v0  ;;  %v174_v0 = vld [vmem:[%s173_s14] sm:$0x1] }
 0x546   :  { %175 = vst.msk [vmem:[#allocation2 + $0x21] sm:$0x1] %vm42_vm0, %v174_v0 }
 0x549   :  { %v1227_v63 = vpop.eup %1226 }
 0x54a   :  { %554 = vrot.lane.b32.xlu2 %v1227_v63, %s1308_s11  ;;  %v170_v63 = vld [vmem:[%s169_s28] sm:$0x1] }
 0x54b   :  { %v1229_v1 = vpop.eup %1228  ;;  %171 = vst.msk [vmem:[#allocation2 + $0x20] sm:$0x1] %vm42_vm0, %v170_v63 }
 0x54c   :  { %v535_v3 = vadd.f32 1.0, %v1229_v1  ;;  %v178_v1 = vld [vmem:[%s177_s20] sm:$0x1] }
 0x54d   :  { %179 = vst.msk [vmem:[#allocation2 + $0x22] sm:$0x1] %vm42_vm0, %v178_v1 }
 0x54e   :  { %1230 = vrcp.f32 %v535_v3  ;;  %v547_v13 = vand.u32 2147483648, %v535_v3  ;;  %vm541_vm11 = vweird.f32 %v535_v3  ;;  %v545_v14 = vand.u32 2147483647, %v535_v3 }
 0x550   :  { %v548_v16 = vor.u32 1.1754944e-38, %v547_v13  ;;  %vm546_vm13 = vcmp.eq.f32.partialorder %v545_v14, 8.507059e+37 }
 0x554   :  { %v1231_v5 = vpop.eup %1230 }
 0x555   :  { %v537_v7 = vmul.f32 %v1231_v5, %v535_v3  ;;  %vm542_vm10 = vweird.f32 %v1231_v5  ;;  %v182_v3 = vld [vmem:[%s181_s24] sm:$0x1] }
 0x556   :  { %vm543_vm12 = vmor %vm541_vm11, %vm542_vm10  ;;  %183 = vst.msk [vmem:[#allocation2 + $0x23] sm:$0x1] %vm42_vm0, %v182_v3 }
 0x557   :  { %v538_v9 = vsub.f32 1.0, %v537_v7  ;;  %v190_v7 = vld [vmem:[%s189_s23] sm:$0x1] }
 0x558   :  { %191 = vst.msk [vmem:[#allocation2 + $0x25] sm:$0x1] %vm42_vm0, %v190_v7 }
 0x559   :  { %v539_v10 = vmul.f32 %v1231_v5, %v538_v9  ;;  %v194_v9 = vld [vmem:[%s193_s13] sm:$0x1] }
 0x55a   :  { %195 = vst.msk [vmem:[#allocation2 + $0x26] sm:$0x1] %vm42_vm0, %v194_v9  ;;  %v377_v9 = vadd.f32 %v1516_v28, %v1672_v23 }
 0x55b   :  { %v540_v11 = vadd.f32 %v1231_v5, %v539_v10  ;;  %v198_v10 = vld [vmem:[%s197_s16] sm:$0x1] }
 0x55c   :  { %199 = vst.msk [vmem:[#allocation2 + $0x27] sm:$0x1] %vm42_vm0, %v198_v10 }
 0x55d   :  { %v544_v15 = vsel %vm543_vm12, %v1231_v5, %v540_v11  ;;  %v186_v5 = vld [vmem:[%s185_s27] sm:$0x1] }
 0x55e   :  { %v549_v18 = vsel %vm546_vm13, %v548_v16, %v544_v15  ;;  %187 = vst.msk [vmem:[#allocation2 + $0x24] sm:$0x1] %vm42_vm0, %v186_v5 }
 0x55f   :  { %v552_v20 = vmul.f32 %v549_v18, %v1680_v45 }
 0x565   :  { %v309_v11 = vld [vmem:[#allocation2 + $0x20] sm:$0xff] }
 0x566   :  { %1176 = vmatmul.msk.f32.gmra.mxu0 %vm316_vm1, %v309_v11 }
 0x5a4   :  { %v555_v17 = vpop.permute.xlu2 %554 }
 0x5a5   :  { %v557_v19 = vmul.f32 %v555_v17, %v549_v18 }
 0x5a7   :  { %559 = vrot.lane.b32.xlu0 %v557_v19, %s1308_s11 }
 0x5e3   :  { %v370_v14 = vpop.f32.mrf.mxu0 }
 0x5e4   :  { %v371_v15 = vadd.f32 %v1516_v28, %v370_v14 }
 0x619   :  { %v560_v21 = vpop.permute.xlu0 %559 }
 0x61a   :  { %v1726_v22 = vadd.f32 %v560_v21, %v552_v20 }
 0x61c   :  { %1232 = vtanh.f32 %v1726_v22 }
 0x622   :  { %v1233_v25 = vpop.eup %1232 }
 0x623   :  { %565 = vrot.lane.b32.xlu1 %v1233_v25, %s1308_s11 }
 0x695   :  { %v566_v33 = vpop.permute.xlu1 %565 }
 0x696   :  { %v1763_v34 = vmul.f32 %v566_v33, %v549_v18 }
 0x698   :  { %570 = vrot.lane.b32.xlu2 %v1763_v34, %s1309_s12 }
 0x6f2   :  { %v571_v35 = vpop.permute.xlu2 %570 }
 0x6f3   :  { %1185 = vmatmul.msk.f32.vlgmr.msra.gmra.mxu1 %vm316_vm1, %v571_v35 }
 0x770   :  { %v591_v38 = vpop.f32.mrf.mxu1 }
 0x771   :  { %v594_v39 = vadd.f32 %v591_v38, %v368_v37 }
 0x773   :  { %1234 = vtanh.f32 %v594_v39  ;;  %v1186_v41 = vmul.f32 -1.442695, %v594_v39 }
 0x775   :  { %1236 = vpow2.f32 %v1186_v41 }
 0x779   :  { %v1235_v40 = vpop.eup %1234 }
 0x77a   :  { %617 = vrot.lane.b32.xlu0 %v1235_v40, %s1308_s11 }
 0x77b   :  { %v1237_v42 = vpop.eup %1236 }
 0x77c   :  { %v598_v43 = vadd.f32 1.0, %v1237_v42  ;;  %v374_v42 = vadd.f32 %v1516_v28, %v1511_v27 }
 0x77e   :  { %1238 = vrcp.f32 %v598_v43  ;;  %v610_v50 = vand.u32 2147483648, %v598_v43  ;;  %vm604_vm15 = vweird.f32 %v598_v43  ;;  %v608_v51 = vand.u32 2147483647, %v598_v43 }
 0x780   :  { %v611_v53 = vor.u32 1.1754944e-38, %v610_v50  ;;  %vm609_vm3 = vcmp.eq.f32.partialorder %v608_v51, 8.507059e+37 }
 0x784   :  { %v1239_v44 = vpop.eup %1238 }
 0x785   :  { %v600_v45 = vmul.f32 %v1239_v44, %v598_v43  ;;  %vm605_vm14 = vweird.f32 %v1239_v44 }
 0x786   :  { %vm606_vm2 = vmor %vm604_vm15, %vm605_vm14 }
 0x787   :  { %v601_v46 = vsub.f32 1.0, %v600_v45 }
 0x789   :  { %v602_v47 = vmul.f32 %v1239_v44, %v601_v46 }
 0x78b   :  { %v603_v49 = vadd.f32 %v1239_v44, %v602_v47 }
 0x78d   :  { %v607_v52 = vsel %vm606_vm2, %v1239_v44, %v603_v49 }
 0x78e   :  { %v612_v55 = vsel %vm609_vm3, %v611_v53, %v607_v52 }
 0x78f   :  { %v615_v57 = vmul.f32 %v612_v55, %v1726_v22 }
 0x7ec   :  { %v618_v54 = vpop.permute.xlu0 %617 }
 0x7ed   :  { %v620_v56 = vmul.f32 %v618_v54, %v612_v55 }
 0x7ef   :  { %622 = vrot.lane.b32.xlu1 %v620_v56, %s1308_s11 }
 0x861   :  { %v623_v58 = vpop.permute.xlu1 %622 }
 0x862   :  { %v1772_v59 = vadd.f32 %v623_v58, %v615_v57 }
 0x864   :  { %1240 = vtanh.f32 %v1772_v59 }
 0x86a   :  { %v1241_v60 = vpop.eup %1240 }
 0x86b   :  { %628 = vrot.lane.b32.xlu2 %v1241_v60, %s1308_s11 }
 0x8c5   :  { %v629_v61 = vpop.permute.xlu2 %628 }
 0x8c6   :  { %v1776_v62 = vmul.f32 %v629_v61, %v612_v55 }
 0x8c8   :  { %633 = vrot.lane.b32.xlu0 %v1776_v62, %s1309_s12 }
 0x93a   :  { %v634_v13 = vpop.permute.xlu0 %633 }
 0x93b   :  { %1187 = vmatmul.msk.f32.vlgmr.msra.gmra.mxu2 %vm316_vm1, %v634_v13 }
 0x9be   :  { %v654_v16 = vpop.f32.mrf.mxu2 }
 0x9bf   :  { %v657_v17 = vadd.f32 %v654_v16, %v371_v15 }
 0x9c1   :  { %1242 = vtanh.f32 %v657_v17  ;;  %v1188_v19 = vmul.f32 -1.442695, %v657_v17 }
 0x9c3   :  { %1244 = vpow2.f32 %v1188_v19 }
 0x9c7   :  { %v1243_v18 = vpop.eup %1242 }
 0x9c8   :  { %680 = vrot.lane.b32.xlu1 %v1243_v18, %s1308_s11 }
 0x9c9   :  { %v1245_v20 = vpop.eup %1244 }
 0x9ca   :  { %v661_v21 = vadd.f32 1.0, %v1245_v20 }
 0x9cc   :  { %1246 = vrcp.f32 %v661_v21  ;;  %v673_v31 = vand.u32 2147483648, %v661_v21  ;;  %vm667_vm4 = vweird.f32 %v661_v21  ;;  %v671_v2 = vand.u32 2147483647, %v661_v21 }
 0x9ce   :  { %v674_v32 = vor.u32 1.1754944e-38, %v673_v31  ;;  %vm672_vm6 = vcmp.eq.f32.partialorder %v671_v2, 8.507059e+37 }
 0x9d2   :  { %v1247_v22 = vpop.eup %1246 }
 0x9d3   :  { %v663_v25 = vmul.f32 %v1247_v22, %v661_v21  ;;  %vm668_vm0 = vweird.f32 %v1247_v22 }
 0x9d4   :  { %vm669_vm5 = vmor %vm667_vm4, %vm668_vm0 }
 0x9d5   :  { %v664_v26 = vsub.f32 1.0, %v663_v25 }
 0x9d7   :  { %v665_v29 = vmul.f32 %v1247_v22, %v664_v26 }
 0x9d9   :  { %v666_v30 = vadd.f32 %v1247_v22, %v665_v29 }
 0x9db   :  { %v670_v4 = vsel %vm669_vm5, %v1247_v22, %v666_v30 }
 0x9dc   :  { %v675_v8 = vsel %vm672_vm6, %v674_v32, %v670_v4 }
 0x9dd   :  { %v678_v35 = vmul.f32 %v675_v8, %v1772_v59 }
 0xa3a   :  { %v681_v6 = vpop.permute.xlu1 %680 }
 0xa3b   :  { %v683_v33 = vmul.f32 %v681_v6, %v675_v8 }
 0xa3d   :  { %685 = vrot.lane.b32.xlu2 %v683_v33, %s1308_s11 }
 0xa97   :  { %v686_v36 = vpop.permute.xlu2 %685 }
 0xa98   :  { %v688_v37 = vadd.f32 %v686_v36, %v678_v35  ;;  %v380_v36 = vadd.f32 %v1516_v28, %v1674_v24 }
 0xa9a   :  { %1248 = vtanh.f32 %v688_v37 }
 0xaa0   :  { %v1249_v38 = vpop.eup %1248 }
 0xaa1   :  { %691 = vrot.lane.b32.xlu0 %v1249_v38, %s1308_s11 }
 0xb13   :  { %v692_v39 = vpop.permute.xlu0 %691 }
 0xb14   :  { %v1819_v40 = vmul.f32 %v692_v39, %v675_v8 }
 0xb16   :  { %696 = vrot.lane.b32.xlu1 %v1819_v40, %s1309_s12 }
 0xb88   :  { %v697_v41 = vpop.permute.xlu1 %696 }
 0xb89   :  { %1189 = vmatmul.msk.f32.vlgmr.msrb.gmra.mxu3 %vm316_vm1, %v697_v41 }
 0xc0c   :  { %v717_v43 = vpop.f32.mrf.mxu3 }
 0xc0d   :  { %v720_v44 = vadd.f32 %v717_v43, %v374_v42 }
 0xc0f   :  { %1250 = vtanh.f32 %v720_v44  ;;  %v1190_v46 = vmul.f32 -1.442695, %v720_v44 }
 0xc11   :  { %1252 = vpow2.f32 %v1190_v46 }
 0xc15   :  { %v1251_v45 = vpop.eup %1250 }
 0xc16   :  { %743 = vrot.lane.b32.xlu2 %v1251_v45, %s1308_s11 }
 0xc17   :  { %v1253_v47 = vpop.eup %1252 }
 0xc18   :  { %v724_v49 = vadd.f32 1.0, %v1253_v47 }
 0xc1a   :  { %1254 = vrcp.f32 %v724_v49  ;;  %v736_v55 = vand.u32 2147483648, %v724_v49  ;;  %vm730_vm8 = vweird.f32 %v724_v49  ;;  %v734_v27 = vand.u32 2147483647, %v724_v49 }
 0xc1c   :  { %v737_v57 = vor.u32 1.1754944e-38, %v736_v55  ;;  %vm735_vm10 = vcmp.eq.f32.partialorder %v734_v27, 8.507059e+37 }
 0xc20   :  { %v1255_v50 = vpop.eup %1254 }
 0xc21   :  { %v726_v51 = vmul.f32 %v1255_v50, %v724_v49  ;;  %vm731_vm7 = vweird.f32 %v1255_v50 }
 0xc22   :  { %vm732_vm9 = vmor %vm730_vm8, %vm731_vm7 }
 0xc23   :  { %v727_v52 = vsub.f32 1.0, %v726_v51 }
 0xc25   :  { %v728_v53 = vmul.f32 %v1255_v50, %v727_v52 }
 0xc27   :  { %v729_v54 = vadd.f32 %v1255_v50, %v728_v53 }
 0xc29   :  { %v733_v56 = vsel %vm732_vm9, %v1255_v50, %v729_v54 }
 0xc2a   :  { %v738_v59 = vsel %vm735_vm10, %v737_v57, %v733_v56 }
 0xc2b   :  { %v741_v61 = vmul.f32 %v738_v59, %v688_v37 }
 0xc70   :  { %v744_v58 = vpop.permute.xlu2 %743 }
 0xc71   :  { %v746_v60 = vmul.f32 %v744_v58, %v738_v59 }
 0xc73   :  { %748 = vrot.lane.b32.xlu0 %v746_v60, %s1308_s11 }
 0xce5   :  { %v749_v63 = vpop.permute.xlu0 %748 }
 0xce6   :  { %v751_v0 = vadd.f32 %v749_v63, %v741_v61 }
 0xce8   :  { %1256 = vtanh.f32 %v751_v0 }
 0xcee   :  { %v1257_v1 = vpop.eup %1256 }
 0xcef   :  { %754 = vrot.lane.b32.xlu1 %v1257_v1, %s1308_s11 }
 0xd61   :  { %v755_v3 = vpop.permute.xlu1 %754 }
 0xd62   :  { %v1829_v5 = vmul.f32 %v755_v3, %v738_v59 }
 0xd64   :  { %759 = vrot.lane.b32.xlu2 %v1829_v5, %s1309_s12 }
 0xdbe   :  { %v760_v7 = vpop.permute.xlu2 %759 }
 0xdbf   :  { %1191 = vmatmul.msk.f32.vlgmr.msrb.gmra.mxu1 %vm316_vm1, %v760_v7 }
 0xe3c   :  { %v780_v10 = vpop.f32.mrf.mxu1 }
 0xe3d   :  { %v783_v11 = vadd.f32 %v780_v10, %v377_v9 }
 0xe3f   :  { %1258 = vtanh.f32 %v783_v11  ;;  %v1192_v14 = vmul.f32 -1.442695, %v783_v11 }
 0xe41   :  { %1260 = vpow2.f32 %v1192_v14 }
 0xe45   :  { %v1259_v13 = vpop.eup %1258 }
 0xe46   :  { %806 = vrot.lane.b32.xlu0 %v1259_v13, %s1308_s11 }
 0xe47   :  { %v1261_v15 = vpop.eup %1260 }
 0xe48   :  { %v787_v16 = vadd.f32 1.0, %v1261_v15 }
 0xe4a   :  { %1262 = vrcp.f32 %v787_v16  ;;  %v799_v22 = vand.u32 2147483648, %v787_v16  ;;  %vm793_vm12 = vweird.f32 %v787_v16  ;;  %v797_v23 = vand.u32 2147483647, %v787_v16 }
 0xe4c   :  { %v800_v26 = vor.u32 1.1754944e-38, %v799_v22  ;;  %vm798_vm14 = vcmp.eq.f32.partialorder %v797_v23, 8.507059e+37 }
 0xe50   :  { %v1263_v17 = vpop.eup %1262 }
 0xe51   :  { %v789_v18 = vmul.f32 %v1263_v17, %v787_v16  ;;  %vm794_vm11 = vweird.f32 %v1263_v17 }
 0xe52   :  { %vm795_vm13 = vmor %vm793_vm12, %vm794_vm11 }
 0xe53   :  { %v790_v19 = vsub.f32 1.0, %v789_v18 }
 0xe55   :  { %v791_v20 = vmul.f32 %v1263_v17, %v790_v19 }
 0xe57   :  { %v792_v21 = vadd.f32 %v1263_v17, %v791_v20 }
 0xe59   :  { %v796_v25 = vsel %vm795_vm13, %v1263_v17, %v792_v21 }
 0xe5a   :  { %v801_v30 = vsel %vm798_vm14, %v800_v26, %v796_v25 }
 0xe5b   :  { %v804_v2 = vmul.f32 %v801_v30, %v751_v0 }
 0xeb8   :  { %v807_v29 = vpop.permute.xlu0 %806 }
 0xeb9   :  { %v809_v31 = vmul.f32 %v807_v29, %v801_v30 }
 0xebb   :  { %811 = vrot.lane.b32.xlu1 %v809_v31, %s1308_s11 }
 0xf2d   :  { %v812_v4 = vpop.permute.xlu1 %811 }
 0xf2e   :  { %v814_v32 = vadd.f32 %v812_v4, %v804_v2 }
 0xf30   :  { %1264 = vtanh.f32 %v814_v32 }
 0xf36   :  { %v1265_v6 = vpop.eup %1264 }
 0xf37   :  { %817 = vrot.lane.b32.xlu2 %v1265_v6, %s1308_s11 }
 0xf91   :  { %v818_v8 = vpop.permute.xlu2 %817 }
 0xf92   :  { %v1839_v33 = vmul.f32 %v818_v8, %v801_v30 }
 0xf94   :  { %822 = vrot.lane.b32.xlu0 %v1839_v33, %s1309_s12 }
0x1006   :  { %v823_v35 = vpop.permute.xlu0 %822 }
0x1007   :  { %1193 = vmatmul.msk.f32.vlgmr.msrb.gmra.mxu2 %vm316_vm1, %v823_v35 }
0x108a   :  { %v843_v37 = vpop.f32.mrf.mxu2 }
0x108b   :  { %v846_v38 = vadd.f32 %v843_v37, %v380_v36 }
0x108d   :  { %1266 = vtanh.f32 %v846_v38  ;;  %v1194_v41 = vmul.f32 -1.442695, %v846_v38 }
0x108f   :  { %1268 = vpow2.f32 %v1194_v41 }
0x1093   :  { %v1267_v39 = vpop.eup %1266 }
0x1094   :  { %869 = vrot.lane.b32.xlu1 %v1267_v39, %s1308_s11 }
0x1095   :  { %v1269_v42 = vpop.eup %1268 }
0x1096   :  { %v850_v43 = vadd.f32 1.0, %v1269_v42 }
0x1098   :  { %1270 = vrcp.f32 %v850_v43  ;;  %v862_v50 = vand.u32 2147483648, %v850_v43  ;;  %vm856_vm2 = vweird.f32 %v850_v43  ;;  %v860_v28 = vand.u32 2147483647, %v850_v43 }
0x109a   :  { %v863_v51 = vor.u32 1.1754944e-38, %v862_v50  ;;  %vm861_vm0 = vcmp.eq.f32.partialorder %v860_v28, 8.507059e+37 }
0x109e   :  { %v1271_v44 = vpop.eup %1270 }
0x109f   :  { %v852_v45 = vmul.f32 %v1271_v44, %v850_v43  ;;  %vm857_vm15 = vweird.f32 %v1271_v44 }
0x10a0   :  { %vm858_vm3 = vmor %vm856_vm2, %vm857_vm15 }
0x10a1   :  { %v853_v46 = vsub.f32 1.0, %v852_v45 }
0x10a3   :  { %v854_v47 = vmul.f32 %v1271_v44, %v853_v46 }
0x10a5   :  { %v855_v49 = vadd.f32 %v1271_v44, %v854_v47 }
0x10a7   :  { %v859_v24 = vsel %vm858_vm3, %v1271_v44, %v855_v49 }
0x10a8   :  { %v864_v53 = vsel %vm861_vm0, %v863_v51, %v859_v24 }
0x10a9   :  { %v867_v55 = vmul.f32 %v864_v53, %v814_v32 }
0x1106   :  { %v870_v52 = vpop.permute.xlu1 %869 }
0x1107   :  { %v872_v54 = vmul.f32 %v870_v52, %v864_v53 }
0x1109   :  { %874 = vrot.lane.b32.xlu2 %v872_v54, %s1308_s11 }
0x1163   :  { %v875_v27 = vpop.permute.xlu2 %874 }
0x1164   :  { %v877_v56 = vadd.f32 %v875_v27, %v867_v55 }
0x1166   :  { %1272 = vtanh.f32 %v877_v56  ;;  %v1009_v56 = vld [vmem:[%s1916_s5 + $0x18] sm:$0xff] }
0x1167   :  { %1031 = vmatpush.msra.mxu3 %v1009_v56 }
0x116c   :  { %v1273_v57 = vpop.eup %1272 }
0x116d   :  { %880 = vrot.lane.b32.xlu0 %v1273_v57, %s1308_s11  ;;  %v1008_v57 = vld [vmem:[%s1916_s5 + $0x10] sm:$0xff] }
0x116e   :  { %1032 = vmatpush.msra.mxu3 %v1008_v57 }
0x11df   :  { %v881_v58 = vpop.permute.xlu0 %880 }
0x11e0   :  { %v1849_v59 = vmul.f32 %v881_v58, %v864_v53 }
0x11e2   :  { %v900_v60 = vmul.f32 %v1849_v59, %v1763_v34  ;;  %v892_v61 = vmul.f32 %v1849_v59, %v1684_v48  ;;  %v884_v63 = vmul.f32 %v1849_v59, %v1630_v12  ;;  %v924_v0 = vmul.f32 %v1849_v59, %v1829_v5 }
0x11e3   :  { %v916_v1 = vmul.f32 %v1849_v59, %v1819_v40  ;;  %v908_v3 = vmul.f32 %v1849_v59, %v1776_v62  ;;  %v940_v7 = vmul.f32 %v1849_v59, %v1849_v59  ;;  %v932_v9 = vmul.f32 %v1849_v59, %v1839_v33 }
0x11e4   :  { %902 = vrot.lane.b32.xlu0 %v900_v60, %s1309_s12  ;;  %894 = vrot.lane.b32.xlu2 %v892_v61, %s1309_s12 }
0x11e5   :  { %886 = vrot.lane.b32.xlu1 %v884_v63, %s1309_s12 }
0x11ec   :  { %926 = vrot.lane.b32.xlu0 %v924_v0, %s1309_s12  ;;  %918 = vrot.lane.b32.xlu2 %v916_v1, %s1309_s12  ;;  %v1007_v0 = vld [vmem:[%s1916_s5 + $0x8] sm:$0xff] }
0x11ed   :  { %910 = vrot.lane.b32.xlu1 %v908_v3, %s1309_s12  ;;  %1033 = vmatpush.msra.mxu3 %v1007_v0 }
0x11f4   :  { %942 = vrot.lane.b32.xlu2 %v940_v7, %s1309_s12 }
0x11f5   :  { %934 = vrot.lane.b32.xlu1 %v932_v9, %s1309_s12 }
0x123e   :  { %v895_v10 = vpop.permute.xlu2 %894 }
0x123f   :  { %v897_v11 = vsel %vm316_vm1, %v895_v10, 0.0  ;;  %v1006_v10 = vld [vmem:[%s1916_s5] sm:$0xff] }
0x1240   :  { %898 = vadd.xlane.f32.xlu1 %v897_v11  ;;  %1034 = vmatpush.msra.mxu3 %v1006_v10 }
0x1246   :  { %v919_v17 = vpop.permute.xlu2 %918 }
0x1247   :  { %v921_v21 = vsel %vm316_vm1, %v919_v17, 0.0 }
0x124e   :  { %v943_v23 = vpop.permute.xlu2 %942 }
0x124f   :  { %v945_v26 = vsel %vm316_vm1, %v943_v23, 0.0 }
0x1256   :  { %v903_v13 = vpop.permute.xlu0 %902 }
0x1257   :  { %v887_v14 = vpop.permute.xlu1 %886  ;;  %v905_v15 = vsel %vm316_vm1, %v903_v13, 0.0 }
0x1258   :  { %906 = vadd.xlane.f32.xlu2 %v905_v15  ;;  %v889_v16 = vsel %vm316_vm1, %v887_v14, 0.0 }
0x1259   :  { %890 = vadd.xlane.f32.xlu0 %v889_v16 }
0x125e   :  { %v927_v18 = vpop.permute.xlu0 %926 }
0x125f   :  { %v911_v19 = vpop.permute.xlu1 %910  ;;  %v929_v20 = vsel %vm316_vm1, %v927_v18, 0.0 }
0x1260   :  { %930 = vadd.xlane.f32.xlu1 %v929_v20  ;;  %v913_v22 = vsel %vm316_vm1, %v911_v19, 0.0 }
0x1261   :  { %922 = vadd.xlane.f32.xlu0 %v921_v21  ;;  %914 = vadd.xlane.f32.xlu2 %v913_v22 }
0x1267   :  { %v935_v25 = vpop.permute.xlu1 %934 }
0x1268   :  { %v937_v29 = vsel %vm316_vm1, %v935_v25, 0.0 }
0x1269   :  { %946 = vadd.xlane.f32.xlu0 %v945_v26  ;;  %938 = vadd.xlane.f32.xlu2 %v937_v29 }
0x12b3   :  { %v899_v2 = vpop.xlane.xlu1 %898 }
0x12cb   :  { %v907_v30 = vpop.xlane.xlu2 %906 }
0x12cc   :  { %v891_v31 = vpop.xlane.xlu0 %890 }
0x12cd   :  { %v948_v4 = vmax.f32 %v891_v31, %v899_v2 }
0x12cf   :  { %v949_v32 = vmax.f32 %v948_v4, %v907_v30 }
0x12d3   :  { %v931_v37 = vpop.xlane.xlu1 %930 }
0x12d4   :  { %v923_v6 = vpop.xlane.xlu0 %922  ;;  %v915_v8 = vpop.xlane.xlu2 %914 }
0x12d5   :  { %v950_v35 = vmax.f32 %v949_v32, %v915_v8 }
0x12d7   :  { %v951_v36 = vmax.f32 %v950_v35, %v923_v6 }
0x12d9   :  { %v952_v38 = vmax.f32 %v951_v36, %v931_v37 }
0x12dc   :  { %v939_v39 = vpop.xlane.xlu2 %938  ;;  %v947_v42 = vpop.xlane.xlu0 %946 }
0x12dd   :  { %v953_v41 = vmax.f32 %v952_v38, %v939_v39 }
0x12df   :  { %v954_v43 = vmax.f32 %v953_v41, %v947_v42 }
0x12e1   :  { %v955_v44 = vsub.f32 %v891_v31, %v954_v43  ;;  %v958_v45 = vsub.f32 %v899_v2, %v954_v43  ;;  %v961_v46 = vsub.f32 %v907_v30, %v954_v43  ;;  %v964_v47 = vsub.f32 %v915_v8, %v954_v43 }
0x12e2   :  { %v967_v24 = vsub.f32 %v923_v6, %v954_v43  ;;  %v970_v52 = vsub.f32 %v931_v37, %v954_v43  ;;  %v973_v54 = vsub.f32 %v939_v39, %v954_v43  ;;  %v976_v27 = vsub.f32 %v947_v42, %v954_v43 }
0x12e3   :  { %v956_v49 = vmul.f32 1.442695, %v955_v44  ;;  %v959_v50 = vmul.f32 1.442695, %v958_v45  ;;  %v962_v28 = vmul.f32 1.442695, %v961_v46 }
0x12e4   :  { %v965_v51 = vmul.f32 1.442695, %v964_v47  ;;  %v968_v53 = vmul.f32 1.442695, %v967_v24  ;;  %v971_v55 = vmul.f32 1.442695, %v970_v52 }
0x12e5   :  { %1274 = vpow2.f32 %v956_v49  ;;  %v974_v61 = vmul.f32 1.442695, %v973_v54  ;;  %v977_v9 = vmul.f32 1.442695, %v976_v27 }
0x12e6   :  { %1276 = vpow2.f32 %v959_v50 }
0x12e7   :  { %1278 = vpow2.f32 %v962_v28 }
0x12e8   :  { %1280 = vpow2.f32 %v965_v51 }
0x12e9   :  { %1282 = vpow2.f32 %v968_v53 }
0x12ea   :  { %1284 = vpow2.f32 %v971_v55 }
0x12eb   :  { %v1275_v58 = vpop.eup %1274  ;;  %1286 = vpow2.f32 %v974_v61 }
0x12ec   :  { %v1277_v60 = vpop.eup %1276  ;;  %v986_v63 = vmul.f32 %v1275_v58, %v1630_v12  ;;  %1288 = vpow2.f32 %v977_v9 }
0x12ed   :  { %v1279_v1 = vpop.eup %1278  ;;  %v979_v3 = vadd.f32 %v1277_v60, %v1275_v58  ;;  %v987_v7 = vmul.f32 %v1277_v60, %v1684_v48 }
0x12ee   :  { %v1281_v14 = vpop.eup %1280  ;;  %v989_v12 = vmul.f32 %v1279_v1, %v1763_v34 }
0x12ef   :  { %v980_v11 = vadd.f32 %v1279_v1, %v979_v3  ;;  %v988_v13 = vadd.f32 %v987_v7, %v986_v63  ;;  %v1283_v16 = vpop.eup %1282  ;;  %v991_v19 = vmul.f32 %v1281_v14, %v1776_v62 }
0x12f0   :  { %v1285_v18 = vpop.eup %1284  ;;  %v993_v26 = vmul.f32 %v1283_v16, %v1819_v40 }
0x12f1   :  { %v981_v15 = vadd.f32 %v1281_v14, %v980_v11  ;;  %v990_v17 = vadd.f32 %v989_v12, %v988_v13  ;;  %v1287_v21 = vpop.eup %1286  ;;  %v995_v34 = vmul.f32 %v1285_v18, %v1829_v5  ;;  %v1209_v5 = vld [vmem:[%s1917_s6] ss:$0 sm:$0xff] }
0x12f2   :  { %v1289_v25 = vpop.eup %1288  ;;  %v997_v2 = vmul.f32 %v1287_v21, %v1839_v33 }
0x12f3   :  { %v982_v48 = vadd.f32 %v1283_v16, %v981_v15  ;;  %v992_v22 = vadd.f32 %v991_v19, %v990_v17  ;;  %v999_v62 = vmul.f32 %v1289_v25, %v1849_v59 }
0x12f5   :  { %v983_v20 = vadd.f32 %v1285_v18, %v982_v48  ;;  %v994_v30 = vadd.f32 %v993_v26, %v992_v22 }
0x12f7   :  { %v984_v23 = vadd.f32 %v1287_v21, %v983_v20  ;;  %v996_v31 = vadd.f32 %v995_v34, %v994_v30 }
0x12f9   :  { %v985_v29 = vadd.f32 %v1289_v25, %v984_v23  ;;  %v998_v32 = vadd.f32 %v997_v2, %v996_v31 }
0x12fb   :  { %1290 = vrcp.f32 %v985_v29  ;;  %v1000_v35 = vadd.f32 %v999_v62, %v998_v32 }
0x1301   :  { %v1291_v4 = vpop.eup %1290 }
0x1302   :  { %v1002_v6 = vmul.f32 %v1291_v4, %v985_v29 }
0x1304   :  { %v1003_v8 = vsub.f32 2.0, %v1002_v6 }
0x1306   :  { %v1004_v36 = vmul.f32 %v1291_v4, %v1003_v8 }
0x1308   :  { %v1005_v37 = vmul.f32 %v1004_v36, %v1000_v35 }
0x130a   :  { %1015 = vrot.lane.b32.xlu1 %v1005_v37, %s1309_s12 }
0x137c   :  { %v1016_v40 = vpop.permute.xlu1 %1015 }
0x137d   :  { %1195 = vmatmul.msk.f32.vlgmr.msra.gmra.mxu3 %vm316_vm1, %v1016_v40 }
0x1400   :  { %v1036_v38 = vpop.f32.mrf.mxu3 }
0x1401   :  { %v1037_v33 = vadd.f32 %v1209_v5, %v1036_v38 }
0x1403   :  { %1039 = vst [vmem:[%s1918_s7] sm:$0xff] %v1037_v33 }
0x1404   :  { %1044 = vsyncpa [#allocation4], 1 }

</bundles_post_ra>
